<compile_context>
chip_gen: v5e
topology: v5e:2x2
jax: 0.10.0
libtpu: 0.0.40
codegen_flags: <defaults>
</compile_context>

<pallas_src>
import math
import functools

import jax
import jax.numpy as jnp
from jax.experimental import pallas as pl
from jax.experimental.pallas import tpu as pltpu

_LN_EPS = 1e-5


# ----------------------------------------------------------------------------- helpers

def _layernorm_f32(x_f32, gamma_f32, beta_f32):
    mu = jnp.mean(x_f32, axis=-1, keepdims=True)
    xc = x_f32 - mu
    var = jnp.mean(xc * xc, axis=-1, keepdims=True)
    inv = jax.lax.rsqrt(var + _LN_EPS)
    return xc * inv * gamma_f32 + beta_f32


def _gelu_f32(x_f32):
    # Exact (erf-based) GELU, matching torch.nn.GELU() default.
    return 0.5 * x_f32 * (1.0 + jax.lax.erf(x_f32 * (1.0 / math.sqrt(2.0))))


def _choose_row_tile(m, requested):
    if m <= 8:
        return m
    requested = max(8, (requested // 8) * 8)
    if m <= requested:
        # Whole problem would fit in one tile: split into two tiles so both TensorCores of a
        # megacore / v7x chip get work; round the half UP to a multiple of 8.
        half = ((((m + 1) // 2) + 7) // 8) * 8
        return m if half >= m else half
    # Streaming case: keep MXU-friendly tiles (>= 128 rows) on large problems.
    if m >= 256:
        requested = max(requested, 128)
    return requested


@functools.lru_cache(maxsize=1)
def _chip_vmem_bytes():
    try:
        return int(pltpu.get_tpu_info().vmem_capacity_bytes)
    except Exception:
        return 64 << 20   # conservative fallback: v7x per-TensorCore VMEM


def _vmem_limit_bytes(resident_elems, streamed_elems, scratch_f32_elems, itemsize):
    # Constant-index (weight/bias) operands are single-buffered (pl.Buffered(1)); streamed row
    # tiles and outputs are double-buffered; f32 intermediates counted separately.  Clamp to
    # the actual chip's VMEM minus headroom so v7x (64 MiB) never sees an impossible request.
    need = (resident_elems + 2 * streamed_elems) * itemsize + 4 * scratch_f32_elems
    need = int(need * 1.25) + (2 << 20)
    cap = _chip_vmem_bytes() - (4 << 20)
    # TODO(synk): if `need` exceeds `cap`, shrink the row tile / tile the FFN hidden dim
    # instead of just capping the request.
    return int(max(min(need, cap), 16 << 20))


def _const_spec(shape):
    # Constant-index operand: DMA'd once; single-buffer it to halve its VMEM footprint.
    return pl.BlockSpec(shape, lambda i: (0, 0), pipeline_mode=pl.Buffered(1))


# ----------------------------------------------------------------------------- kernels

def _ln_qkv_kernel(x_ref, g_ref, b_ref, w_ref, bias_ref, qkv_ref):
    x = x_ref[...]
    y = _layernorm_f32(x.astype(jnp.float32),
                       g_ref[...].astype(jnp.float32),
                       b_ref[...].astype(jnp.float32))
    # Feed the MXU in the native dtype; accumulate in f32.
    y = y.astype(x.dtype)
    acc = jnp.dot(y, w_ref[...], preferred_element_type=jnp.float32)
    acc = acc + bias_ref[...].astype(jnp.float32)
    qkv_ref[...] = jnp.maximum(acc, 0.0).astype(qkv_ref.dtype)   # ReLU (activation1)


def _attention_kernel(qkv_ref, o_ref, *, heads, head_dim, embed_dim, scale):
    # qkv_ref: (seq, 3E) block for one batch element; columns are [Q | K | V].
    qkv = qkv_ref[...]
    outs = []
    for h in range(heads):
        lo = h * head_dim
        q = qkv[:, lo:lo + head_dim]
        k = qkv[:, embed_dim + lo:embed_dim + lo + head_dim]
        v = qkv[:, 2 * embed_dim + lo:2 * embed_dim + lo + head_dim]
        # q @ k.T without materializing the transpose (MXU handles transposed operand).
        s = jax.lax.dot_general(q, k, (((1,), (1,)), ((), ())),
                                preferred_element_type=jnp.float32) * scale
        m_row = jnp.max(s, axis=-1, keepdims=True)
        p = jnp.exp(s - m_row)
        l_row = jnp.sum(p, axis=-1, keepdims=True)
        # Attention dropout: identity (eval mode).
        # Deferred normalization: PV on unnormalized p, then scale by 1/l (per row).
        o = jnp.dot(p.astype(qkv.dtype), v, preferred_element_type=jnp.float32)
        o = o * pl.reciprocal(l_row, approx=False)
        outs.append(o)
    # Merge heads in-kernel -> one lane-dense (seq, E) store (no masked sub-128 stores).
    o_ref[...] = jnp.concatenate(outs, axis=-1).astype(o_ref.dtype)


def _ln_ffn_kernel(attn_ref, x_ref, g_ref, b_ref, w1_ref, b1_ref,
                   w2_ref, b2_ref, o_ref):
    # Residual add of the attention output (f32), then LayerNorm2.
    r = attn_ref[...].astype(jnp.float32) + x_ref[...].astype(jnp.float32)
    y = _layernorm_f32(r, g_ref[...].astype(jnp.float32),
                       b_ref[...].astype(jnp.float32))
    y = y.astype(attn_ref.dtype)

    h = jnp.dot(y, w1_ref[...], preferred_element_type=jnp.float32)
    h = h + b1_ref[...].astype(jnp.float32)
    h = _gelu_f32(h)
    # Dropout: identity (eval mode).  Cast back to native dtype for the FC2 MXU dot.
    h = h.astype(attn_ref.dtype)

    out = jnp.dot(h, w2_ref[...], preferred_element_type=jnp.float32)
    out = out + b2_ref[...].astype(jnp.float32)
    o_ref[...] = (out + r).astype(o_ref.dtype)


# ----------------------------------------------------------------------------- wrappers

def _ln_qkv(x2d, g, b, wqkv, bqkv, row_tile):
    m, e = x2d.shape
    e3 = wqkv.shape[1]
    tm = _choose_row_tile(m, row_tile)
    row = lambda i: (i, 0)
    itemsize = x2d.dtype.itemsize
    vmem = _vmem_limit_bytes(resident_elems=e * e3 + e3 + 2 * e,
                             streamed_elems=tm * e + tm * e3,
                             scratch_f32_elems=2 * tm * e + 2 * tm * e3,
                             itemsize=itemsize)
    return pl.pallas_call(
        _ln_qkv_kernel,
        out_shape=jax.ShapeDtypeStruct((m, e3), x2d.dtype),
        grid_spec=pltpu.PrefetchScalarGridSpec(
            num_scalar_prefetch=0,
            grid=(pl.cdiv(m, tm),),
            in_specs=[
                pl.BlockSpec((tm, e), row),      # x rows (streamed, double-buffered)
                _const_spec((1, e)),             # gamma1
                _const_spec((1, e)),             # beta1
                _const_spec((e, e3)),            # fused W_qkv
                _const_spec((1, e3)),            # fused b_qkv
            ],
            out_specs=pl.BlockSpec((tm, e3), row),
        ),
        compiler_params=pltpu.CompilerParams(
            dimension_semantics=("parallel",),
            vmem_limit_bytes=vmem),
    )(x2d, g, b, wqkv, bqkv)


def _attention(qkv2d, batch, seq, heads, head_dim, scale):
    m, e3 = qkv2d.shape
    e = e3 // 3
    itemsize = qkv2d.dtype.itemsize
    vmem = _vmem_limit_bytes(resident_elems=0,
                             streamed_elems=seq * e3 + seq * e,
                             scratch_f32_elems=heads * seq * seq + 2 * seq * e3,
                             itemsize=itemsize)
    # TODO(synk): for tiny batch on v7x, grid over (batch, q-row tiles) so both TensorCores
    # stay busy; kept per-batch here so the output store is one lane-dense (seq, E) slab.
    return pl.pallas_call(
        functools.partial(_attention_kernel, heads=heads, head_dim=head_dim,
                          embed_dim=e, scale=scale),
        out_shape=jax.ShapeDtypeStruct((m, e), qkv2d.dtype),
        grid_spec=pltpu.PrefetchScalarGridSpec(
            num_scalar_prefetch=0,
            grid=(batch,),
            in_specs=[pl.BlockSpec((seq, e3), lambda bi: (bi, 0))],
            out_specs=pl.BlockSpec((seq, e), lambda bi: (bi, 0)),
        ),
        compiler_params=pltpu.CompilerParams(
            dimension_semantics=("parallel",),
            vmem_limit_bytes=vmem),
    )(qkv2d)


def _ln_ffn(attn2d, x2d, g, b, w1, b1, w2, b2, row_tile):
    m, e = x2d.shape
    hf = w1.shape[1]
    tm = _choose_row_tile(m, row_tile)
    row = lambda i: (i, 0)
    itemsize = x2d.dtype.itemsize
    vmem = _vmem_limit_bytes(resident_elems=2 * e * hf + 3 * e + hf,
                             streamed_elems=3 * tm * e,
                             scratch_f32_elems=3 * tm * e + 2 * tm * hf,
                             itemsize=itemsize)
    return pl.pallas_call(
        _ln_ffn_kernel,
        out_shape=jax.ShapeDtypeStruct((m, e), x2d.dtype),
        grid_spec=pltpu.PrefetchScalarGridSpec(
            num_scalar_prefetch=0,
            grid=(pl.cdiv(m, tm),),
            in_specs=[
                pl.BlockSpec((tm, e), row),      # attention output rows
                pl.BlockSpec((tm, e), row),      # original x rows (residual)
                _const_spec((1, e)),             # gamma2
                _const_spec((1, e)),             # beta2
                _const_spec((e, hf)),            # W1
                _const_spec((1, hf)),            # b1
                _const_spec((hf, e)),            # W2
                _const_spec((1, e)),             # b2
            ],
            out_specs=pl.BlockSpec((tm, e), row),
        ),
        compiler_params=pltpu.CompilerParams(
            dimension_semantics=("parallel",),
            vmem_limit_bytes=vmem),
    )(attn2d, x2d, g, b, w1, b1, w2, b2)


@functools.partial(jax.jit, static_argnames=("heads", "row_tile"))
def transformer_block(x, params, *, heads, row_tile=512):
    """x: (batch, seq, embed) -> (batch, seq, embed).  Eval-mode forward."""
    (g1, be1, wq, bq, wk, bk, wv, bv, g2, be2, w1, b1, w2, b2) = params
    batch, seq, embed = x.shape
    assert embed % heads == 0, "embed_dim must be divisible by heads"
    assert batch == 1 or seq % 8 == 0, "seq must be a multiple of 8 (sublane tiling)"
    hd = embed // heads
    m = batch * seq
    x2d = x.reshape(m, embed)
    as_row = lambda t: t.reshape(1, -1)

    # Pack Q|K|V into one (E, 3E) weight: LN1 output feeds a single wide MXU dot and the
    # kernel emits one lane-dense (tm, 3E) slab consumed directly by the attention kernel
    # (no XLA-level head split/merge transposes anywhere).
    wqkv = jnp.concatenate([wq, wk, wv], axis=1)
    bqkv = jnp.concatenate([bq, bk, bv], axis=0)

    qkv2d = _ln_qkv(x2d, as_row(g1), as_row(be1), wqkv, as_row(bqkv), row_tile)
    attn2d = _attention(qkv2d, batch, seq, heads, hd, scale=1.0 / math.sqrt(hd))
    out2d = _ln_ffn(attn2d, x2d, as_row(g2), as_row(be2),
                    w1, as_row(b1), w2, as_row(b2), row_tile)
    return out2d.reshape(batch, seq, embed)


# ----------------------------------------------------------------------------- params & reference

def init_params(key, embed_dim, forward_expansion=1, dtype=jnp.float32):
    """Deterministic init mimicking torch defaults (Linear: U(+-1/sqrt(fan_in)); LN: 1/0)."""
    hidden = embed_dim * forward_expansion
    keys = jax.random.split(key, 5)

    def linear(k, fan_in, fan_out):
        kw, kb = jax.random.split(k)
        bound = 1.0 / math.sqrt(fan_in)
        w = jax.random.uniform(kw, (fan_in, fan_out), dtype, -bound, bound)  # == torch weight.T
        b = jax.random.uniform(kb, (fan_out,), dtype, -bound, bound)
        return w, b

    wq, bq = linear(keys[0], embed_dim, embed_dim)
    wk, bk = linear(keys[1], embed_dim, embed_dim)
    wv, bv = linear(keys[2], embed_dim, embed_dim)
    w1, b1 = linear(keys[3], embed_dim, hidden)
    w2, b2 = linear(keys[4], hidden, embed_dim)
    g1 = jnp.ones((embed_dim,), dtype)
    be1 = jnp.zeros((embed_dim,), dtype)
    g2 = jnp.ones((embed_dim,), dtype)
    be2 = jnp.zeros((embed_dim,), dtype)
    return (g1, be1, wq, bq, wk, bk, wv, bv, g2, be2, w1, b1, w2, b2)


def _reference(x, params, heads):
    (g1, be1, wq, bq, wk, bk, wv, bv, g2, be2, w1, b1, w2, b2) = params
    batch, seq, embed = x.shape
    hd = embed // heads

    def ln(t, g, b):
        mu = t.mean(-1, keepdims=True)
        var = ((t - mu) ** 2).mean(-1, keepdims=True)
        return (t - mu) / jnp.sqrt(var + _LN_EPS) * g + b

    res = x
    h = ln(x, g1, be1)
    q = jnp.maximum(h @ wq + bq, 0.0)
    k = jnp.maximum(h @ wk + bk, 0.0)
    v = jnp.maximum(h @ wv + bv, 0.0)

    def split(t):
        return t.reshape(batch, seq, heads, hd).transpose(0, 2, 1, 3).reshape(batch * heads, seq, hd)

    q, k, v = split(q), split(k), split(v)
    sc = jax.nn.softmax(jnp.einsum('bqd,bkd->bqk', q, k) / math.sqrt(hd), axis=-1)
    o = jnp.einsum('bqk,bkd->bqd', sc, v)
    o = o.reshape(batch, heads, seq, hd).transpose(0, 2, 1, 3).reshape(batch, seq, embed)
    out = o + res
    res2 = out
    h2 = ln(out, g2, be2)
    h2 = h2 @ w1 + b1
    h2 = 0.5 * h2 * (1.0 + jax.lax.erf(h2 / math.sqrt(2.0)))
    h2 = h2 @ w2 + b2
    return h2 + res2


if __name__ == "__main__":
    key = jax.random.PRNGKey(0)
    kx, kp = jax.random.split(key)

    batch, seq, embed, heads = 2, 8, 32, 8
    forward_expansion = 1

    x = jax.random.normal(kx, (batch, seq, embed), jnp.float32)
    params = init_params(kp, embed, forward_expansion)

    out = transformer_block(x, params, heads=heads)
    out = jax.block_until_ready(out)

    ref = _reference(x, params, heads)
    assert out.shape == (batch, seq, embed)
    # f32 path matches the reference tightly; bf16 inputs would need a looser tolerance.
    assert jnp.allclose(out, ref, atol=1e-4, rtol=1e-4), "mismatch vs reference"

    print("KERNEL_OK")
</pallas_src>

<mosaic_0001>
module attributes {stable_mosaic.version = 11 : i64} {
  func.func @_ln_qkv_kernel(%arg0: i32, %arg1: memref<8x32xf32, #tpu.memory_space<vmem>>, %arg2: memref<1x32xf32, #tpu.memory_space<vmem>>, %arg3: memref<1x32xf32, #tpu.memory_space<vmem>>, %arg4: memref<32x96xf32, #tpu.memory_space<vmem>>, %arg5: memref<1x96xf32, #tpu.memory_space<vmem>>, %arg6: memref<8x96xf32, #tpu.memory_space<vmem>>) attributes {dimension_semantics = [#tpu.dimension_semantics<parallel>], iteration_bounds = array<i64: 2>, scalar_prefetch = 0 : i64, scratch_operands = 0 : i64, tpu.core_type = #tpu.core_type<tc>, window_params = [{transform_indices = @transform_0, window_bounds = array<i64: 8, 32>}, {pipeline_mode = #tpu.pipeline_mode<synchronous>, transform_indices = @transform_1, window_bounds = array<i64: 1, 32>}, {pipeline_mode = #tpu.pipeline_mode<synchronous>, transform_indices = @transform_2, window_bounds = array<i64: 1, 32>}, {pipeline_mode = #tpu.pipeline_mode<synchronous>, transform_indices = @transform_3, window_bounds = array<i64: 32, 96>}, {pipeline_mode = #tpu.pipeline_mode<synchronous>, transform_indices = @transform_4, window_bounds = array<i64: 1, 96>}, {transform_indices = @transform_5, window_bounds = array<i64: 8, 96>}]} {
    %c0 = arith.constant 0 : index
    %c0_0 = arith.constant 0 : index
    %0 = vector.load %arg1[%c0, %c0_0] : memref<8x32xf32, #tpu.memory_space<vmem>>, vector<8x32xf32>
    %c0_1 = arith.constant 0 : index
    %c0_2 = arith.constant 0 : index
    %1 = vector.load %arg2[%c0_1, %c0_2] : memref<1x32xf32, #tpu.memory_space<vmem>>, vector<1x32xf32>
    %c0_3 = arith.constant 0 : index
    %c0_4 = arith.constant 0 : index
    %2 = vector.load %arg3[%c0_3, %c0_4] : memref<1x32xf32, #tpu.memory_space<vmem>>, vector<1x32xf32>
    %cst = arith.constant dense<0.000000e+00> : vector<8xf32>
    %3 = vector.multi_reduction <add>, %0, %cst [1] : vector<8x32xf32> to vector<8xf32>
    %4 = vector.shape_cast %3 : vector<8xf32> to vector<8x1xf32>
    %cst_5 = arith.constant 3.200000e+01 : f32
    %5 = vector.broadcast %cst_5 : f32 to vector<8x1xf32>
    %6 = arith.divf %4, %5 : vector<8x1xf32>
    %7 = vector.broadcast %6 : vector<8x1xf32> to vector<8x32xf32>
    %8 = arith.subf %0, %7 : vector<8x32xf32>
    %9 = arith.mulf %8, %8 : vector<8x32xf32>
    %cst_6 = arith.constant dense<0.000000e+00> : vector<8xf32>
    %10 = vector.multi_reduction <add>, %9, %cst_6 [1] : vector<8x32xf32> to vector<8xf32>
    %11 = vector.shape_cast %10 : vector<8xf32> to vector<8x1xf32>
    %cst_7 = arith.constant 3.200000e+01 : f32
    %12 = vector.broadcast %cst_7 : f32 to vector<8x1xf32>
    %13 = arith.divf %11, %12 : vector<8x1xf32>
    %cst_8 = arith.constant 9.99999974E-6 : f32
    %14 = vector.broadcast %cst_8 : f32 to vector<8x1xf32>
    %15 = arith.addf %13, %14 : vector<8x1xf32>
    %16 = math.rsqrt %15 : vector<8x1xf32>
    %17 = vector.broadcast %16 : vector<8x1xf32> to vector<8x32xf32>
    %18 = arith.mulf %8, %17 : vector<8x32xf32>
    %19 = vector.broadcast %1 : vector<1x32xf32> to vector<8x32xf32>
    %20 = arith.mulf %18, %19 : vector<8x32xf32>
    %21 = vector.broadcast %2 : vector<1x32xf32> to vector<8x32xf32>
    %22 = arith.addf %20, %21 : vector<8x32xf32>
    %c0_9 = arith.constant 0 : index
    %c0_10 = arith.constant 0 : index
    %23 = vector.load %arg4[%c0_9, %c0_10] : memref<32x96xf32, #tpu.memory_space<vmem>>, vector<32x96xf32>
    %cst_11 = arith.constant dense<0.000000e+00> : vector<8x96xf32>
    %24 = tpu.matmul %22, %23, %cst_11 {dimension_numbers = #tpu.dot_dimension_numbers<[1], [0], [0], [1], [0, 0, 1, 1], [], []>} : vector<8x32xf32>, vector<32x96xf32>, vector<8x96xf32> -> vector<8x96xf32>
    %c0_12 = arith.constant 0 : index
    %c0_13 = arith.constant 0 : index
    %25 = vector.load %arg5[%c0_12, %c0_13] : memref<1x96xf32, #tpu.memory_space<vmem>>, vector<1x96xf32>
    %26 = vector.broadcast %25 : vector<1x96xf32> to vector<8x96xf32>
    %27 = arith.addf %24, %26 : vector<8x96xf32>
    %cst_14 = arith.constant 0.000000e+00 : f32
    %28 = vector.broadcast %cst_14 : f32 to vector<8x96xf32>
    %29 = arith.maximumf %27, %28 : vector<8x96xf32>
    %c0_15 = arith.constant 0 : index
    %c0_16 = arith.constant 0 : index
    %30 = vector.load %arg6[%c0_15, %c0_16] : memref<8x96xf32, #tpu.memory_space<vmem>>, vector<8x96xf32>
    tpu.vector_store %arg6[%c0_15, %c0_16], %29 {strides = array<i32>} : memref<8x96xf32, #tpu.memory_space<vmem>>, vector<8x96xf32>,
    return
  }
  func.func @transform_0(%arg0: i32) -> (i32, i32) {
    %c0_i32 = arith.constant 0 : i32
    %c0_i32_0 = arith.constant 0 : i32
    return %arg0, %c0_i32 : i32, i32
  }
  func.func @transform_1(%arg0: i32) -> (i32, i32) {
    %c0_i32 = arith.constant 0 : i32
    %c0_i32_0 = arith.constant 0 : i32
    %c0_i32_1 = arith.constant 0 : i32
    return %c0_i32, %c0_i32_0 : i32, i32
  }
  func.func @transform_2(%arg0: i32) -> (i32, i32) {
    %c0_i32 = arith.constant 0 : i32
    %c0_i32_0 = arith.constant 0 : i32
    %c0_i32_1 = arith.constant 0 : i32
    return %c0_i32, %c0_i32_0 : i32, i32
  }
  func.func @transform_3(%arg0: i32) -> (i32, i32) {
    %c0_i32 = arith.constant 0 : i32
    %c0_i32_0 = arith.constant 0 : i32
    %c0_i32_1 = arith.constant 0 : i32
    return %c0_i32, %c0_i32_0 : i32, i32
  }
  func.func @transform_4(%arg0: i32) -> (i32, i32) {
    %c0_i32 = arith.constant 0 : i32
    %c0_i32_0 = arith.constant 0 : i32
    %c0_i32_1 = arith.constant 0 : i32
    return %c0_i32, %c0_i32_0 : i32, i32
  }
  func.func @transform_5(%arg0: i32) -> (i32, i32) {
    %c0_i32 = arith.constant 0 : i32
    %c0_i32_0 = arith.constant 0 : i32
    return %arg0, %c0_i32 : i32, i32
  }
}

module attributes {stable_mosaic.version = 11 : i64} {
  func.func @_attention_kernel(%arg0: i32, %arg1: memref<8x96xf32, #tpu.memory_space<vmem>>, %arg2: memref<8x32xf32, #tpu.memory_space<vmem>>) attributes {dimension_semantics = [#tpu.dimension_semantics<parallel>], iteration_bounds = array<i64: 2>, scalar_prefetch = 0 : i64, scratch_operands = 0 : i64, tpu.core_type = #tpu.core_type<tc>, window_params = [{transform_indices = @transform_0, window_bounds = array<i64: 8, 96>}, {transform_indices = @transform_1, window_bounds = array<i64: 8, 32>}]} {
    %c0 = arith.constant 0 : index
    %c0_0 = arith.constant 0 : index
    %0 = vector.load %arg1[%c0, %c0_0] : memref<8x96xf32, #tpu.memory_space<vmem>>, vector<8x96xf32>
    %1 = vector.extract_strided_slice %0 {offsets = [0, 0], sizes = [8, 4], strides = [1, 1]} : vector<8x96xf32> to vector<8x4xf32>
    %2 = vector.extract_strided_slice %0 {offsets = [0, 32], sizes = [8, 4], strides = [1, 1]} : vector<8x96xf32> to vector<8x4xf32>
    %3 = vector.extract_strided_slice %0 {offsets = [0, 64], sizes = [8, 4], strides = [1, 1]} : vector<8x96xf32> to vector<8x4xf32>
    %cst = arith.constant dense<0.000000e+00> : vector<8x8xf32>
    %4 = tpu.matmul %1, %2, %cst {dimension_numbers = #tpu.dot_dimension_numbers<[1], [1], [0], [0], [0, 0, 1, 0], [], []>} : vector<8x4xf32>, vector<8x4xf32>, vector<8x8xf32> -> vector<8x8xf32>
    %cst_1 = arith.constant 5.000000e-01 : f32
    %5 = vector.broadcast %cst_1 : f32 to vector<8x8xf32>
    %6 = arith.mulf %4, %5 : vector<8x8xf32>
    %cst_2 = arith.constant dense<0xFF800000> : vector<8xf32>
    %7 = vector.multi_reduction <maximumf>, %6, %cst_2 [1] : vector<8x8xf32> to vector<8xf32>
    %8 = vector.shape_cast %7 : vector<8xf32> to vector<8x1xf32>
    %9 = vector.broadcast %8 : vector<8x1xf32> to vector<8x8xf32>
    %10 = arith.subf %6, %9 : vector<8x8xf32>
    %11 = math.exp %10 : vector<8x8xf32>
    %cst_3 = arith.constant dense<0.000000e+00> : vector<8xf32>
    %12 = vector.multi_reduction <add>, %11, %cst_3 [1] : vector<8x8xf32> to vector<8xf32>
    %13 = vector.shape_cast %12 : vector<8xf32> to vector<8x1xf32>
    %cst_4 = arith.constant dense<0.000000e+00> : vector<8x4xf32>
    %14 = tpu.matmul %11, %3, %cst_4 {dimension_numbers = #tpu.dot_dimension_numbers<[1], [0], [0], [1], [0, 0, 1, 1], [], []>} : vector<8x8xf32>, vector<8x4xf32>, vector<8x4xf32> -> vector<8x4xf32>
    %15 = tpu.reciprocal %13 : vector<8x1xf32> -> vector<8x1xf32>
    %16 = vector.broadcast %15 : vector<8x1xf32> to vector<8x4xf32>
    %17 = arith.mulf %14, %16 : vector<8x4xf32>
    %18 = vector.extract_strided_slice %0 {offsets = [0, 4], sizes = [8, 4], strides = [1, 1]} : vector<8x96xf32> to vector<8x4xf32>
    %19 = vector.extract_strided_slice %0 {offsets = [0, 36], sizes = [8, 4], strides = [1, 1]} : vector<8x96xf32> to vector<8x4xf32>
    %20 = vector.extract_strided_slice %0 {offsets = [0, 68], sizes = [8, 4], strides = [1, 1]} : vector<8x96xf32> to vector<8x4xf32>
    %cst_5 = arith.constant dense<0.000000e+00> : vector<8x8xf32>
    %21 = tpu.matmul %18, %19, %cst_5 {dimension_numbers = #tpu.dot_dimension_numbers<[1], [1], [0], [0], [0, 0, 1, 0], [], []>} : vector<8x4xf32>, vector<8x4xf32>, vector<8x8xf32> -> vector<8x8xf32>
    %cst_6 = arith.constant 5.000000e-01 : f32
    %22 = vector.broadcast %cst_6 : f32 to vector<8x8xf32>
    %23 = arith.mulf %21, %22 : vector<8x8xf32>
    %cst_7 = arith.constant dense<0xFF800000> : vector<8xf32>
    %24 = vector.multi_reduction <maximumf>, %23, %cst_7 [1] : vector<8x8xf32> to vector<8xf32>
    %25 = vector.shape_cast %24 : vector<8xf32> to vector<8x1xf32>
    %26 = vector.broadcast %25 : vector<8x1xf32> to vector<8x8xf32>
    %27 = arith.subf %23, %26 : vector<8x8xf32>
    %28 = math.exp %27 : vector<8x8xf32>
    %cst_8 = arith.constant dense<0.000000e+00> : vector<8xf32>
    %29 = vector.multi_reduction <add>, %28, %cst_8 [1] : vector<8x8xf32> to vector<8xf32>
    %30 = vector.shape_cast %29 : vector<8xf32> to vector<8x1xf32>
    %cst_9 = arith.constant dense<0.000000e+00> : vector<8x4xf32>
    %31 = tpu.matmul %28, %20, %cst_9 {dimension_numbers = #tpu.dot_dimension_numbers<[1], [0], [0], [1], [0, 0, 1, 1], [], []>} : vector<8x8xf32>, vector<8x4xf32>, vector<8x4xf32> -> vector<8x4xf32>
    %32 = tpu.reciprocal %30 : vector<8x1xf32> -> vector<8x1xf32>
    %33 = vector.broadcast %32 : vector<8x1xf32> to vector<8x4xf32>
    %34 = arith.mulf %31, %33 : vector<8x4xf32>
    %35 = vector.extract_strided_slice %0 {offsets = [0, 8], sizes = [8, 4], strides = [1, 1]} : vector<8x96xf32> to vector<8x4xf32>
    %36 = vector.extract_strided_slice %0 {offsets = [0, 40], sizes = [8, 4], strides = [1, 1]} : vector<8x96xf32> to vector<8x4xf32>
    %37 = vector.extract_strided_slice %0 {offsets = [0, 72], sizes = [8, 4], strides = [1, 1]} : vector<8x96xf32> to vector<8x4xf32>
    %cst_10 = arith.constant dense<0.000000e+00> : vector<8x8xf32>
    %38 = tpu.matmul %35, %36, %cst_10 {dimension_numbers = #tpu.dot_dimension_numbers<[1], [1], [0], [0], [0, 0, 1, 0], [], []>} : vector<8x4xf32>, vector<8x4xf32>, vector<8x8xf32> -> vector<8x8xf32>
    %cst_11 = arith.constant 5.000000e-01 : f32
    %39 = vector.broadcast %cst_11 : f32 to vector<8x8xf32>
    %40 = arith.mulf %38, %39 : vector<8x8xf32>
    %cst_12 = arith.constant dense<0xFF800000> : vector<8xf32>
    %41 = vector.multi_reduction <maximumf>, %40, %cst_12 [1] : vector<8x8xf32> to vector<8xf32>
    %42 = vector.shape_cast %41 : vector<8xf32> to vector<8x1xf32>
    %43 = vector.broadcast %42 : vector<8x1xf32> to vector<8x8xf32>
    %44 = arith.subf %40, %43 : vector<8x8xf32>
    %45 = math.exp %44 : vector<8x8xf32>
    %cst_13 = arith.constant dense<0.000000e+00> : vector<8xf32>
    %46 = vector.multi_reduction <add>, %45, %cst_13 [1] : vector<8x8xf32> to vector<8xf32>
    %47 = vector.shape_cast %46 : vector<8xf32> to vector<8x1xf32>
    %cst_14 = arith.constant dense<0.000000e+00> : vector<8x4xf32>
    %48 = tpu.matmul %45, %37, %cst_14 {dimension_numbers = #tpu.dot_dimension_numbers<[1], [0], [0], [1], [0, 0, 1, 1], [], []>} : vector<8x8xf32>, vector<8x4xf32>, vector<8x4xf32> -> vector<8x4xf32>
    %49 = tpu.reciprocal %47 : vector<8x1xf32> -> vector<8x1xf32>
    %50 = vector.broadcast %49 : vector<8x1xf32> to vector<8x4xf32>
    %51 = arith.mulf %48, %50 : vector<8x4xf32>
    %52 = vector.extract_strided_slice %0 {offsets = [0, 12], sizes = [8, 4], strides = [1, 1]} : vector<8x96xf32> to vector<8x4xf32>
    %53 = vector.extract_strided_slice %0 {offsets = [0, 44], sizes = [8, 4], strides = [1, 1]} : vector<8x96xf32> to vector<8x4xf32>
    %54 = vector.extract_strided_slice %0 {offsets = [0, 76], sizes = [8, 4], strides = [1, 1]} : vector<8x96xf32> to vector<8x4xf32>
    %cst_15 = arith.constant dense<0.000000e+00> : vector<8x8xf32>
    %55 = tpu.matmul %52, %53, %cst_15 {dimension_numbers = #tpu.dot_dimension_numbers<[1], [1], [0], [0], [0, 0, 1, 0], [], []>} : vector<8x4xf32>, vector<8x4xf32>, vector<8x8xf32> -> vector<8x8xf32>
    %cst_16 = arith.constant 5.000000e-01 : f32
    %56 = vector.broadcast %cst_16 : f32 to vector<8x8xf32>
    %57 = arith.mulf %55, %56 : vector<8x8xf32>
    %cst_17 = arith.constant dense<0xFF800000> : vector<8xf32>
    %58 = vector.multi_reduction <maximumf>, %57, %cst_17 [1] : vector<8x8xf32> to vector<8xf32>
    %59 = vector.shape_cast %58 : vector<8xf32> to vector<8x1xf32>
    %60 = vector.broadcast %59 : vector<8x1xf32> to vector<8x8xf32>
    %61 = arith.subf %57, %60 : vector<8x8xf32>
    %62 = math.exp %61 : vector<8x8xf32>
    %cst_18 = arith.constant dense<0.000000e+00> : vector<8xf32>
    %63 = vector.multi_reduction <add>, %62, %cst_18 [1] : vector<8x8xf32> to vector<8xf32>
    %64 = vector.shape_cast %63 : vector<8xf32> to vector<8x1xf32>
    %cst_19 = arith.constant dense<0.000000e+00> : vector<8x4xf32>
    %65 = tpu.matmul %62, %54, %cst_19 {dimension_numbers = #tpu.dot_dimension_numbers<[1], [0], [0], [1], [0, 0, 1, 1], [], []>} : vector<8x8xf32>, vector<8x4xf32>, vector<8x4xf32> -> vector<8x4xf32>
    %66 = tpu.reciprocal %64 : vector<8x1xf32> -> vector<8x1xf32>
    %67 = vector.broadcast %66 : vector<8x1xf32> to vector<8x4xf32>
    %68 = arith.mulf %65, %67 : vector<8x4xf32>
    %69 = vector.extract_strided_slice %0 {offsets = [0, 16], sizes = [8, 4], strides = [1, 1]} : vector<8x96xf32> to vector<8x4xf32>
    %70 = vector.extract_strided_slice %0 {offsets = [0, 48], sizes = [8, 4], strides = [1, 1]} : vector<8x96xf32> to vector<8x4xf32>
    %71 = vector.extract_strided_slice %0 {offsets = [0, 80], sizes = [8, 4], strides = [1, 1]} : vector<8x96xf32> to vector<8x4xf32>
    %cst_20 = arith.constant dense<0.000000e+00> : vector<8x8xf32>
    %72 = tpu.matmul %69, %70, %cst_20 {dimension_numbers = #tpu.dot_dimension_numbers<[1], [1], [0], [0], [0, 0, 1, 0], [], []>} : vector<8x4xf32>, vector<8x4xf32>, vector<8x8xf32> -> vector<8x8xf32>
    %cst_21 = arith.constant 5.000000e-01 : f32
    %73 = vector.broadcast %cst_21 : f32 to vector<8x8xf32>
    %74 = arith.mulf %72, %73 : vector<8x8xf32>
    %cst_22 = arith.constant dense<0xFF800000> : vector<8xf32>
    %75 = vector.multi_reduction <maximumf>, %74, %cst_22 [1] : vector<8x8xf32> to vector<8xf32>
    %76 = vector.shape_cast %75 : vector<8xf32> to vector<8x1xf32>
    %77 = vector.broadcast %76 : vector<8x1xf32> to vector<8x8xf32>
    %78 = arith.subf %74, %77 : vector<8x8xf32>
    %79 = math.exp %78 : vector<8x8xf32>
    %cst_23 = arith.constant dense<0.000000e+00> : vector<8xf32>
    %80 = vector.multi_reduction <add>, %79, %cst_23 [1] : vector<8x8xf32> to vector<8xf32>
    %81 = vector.shape_cast %80 : vector<8xf32> to vector<8x1xf32>
    %cst_24 = arith.constant dense<0.000000e+00> : vector<8x4xf32>
    %82 = tpu.matmul %79, %71, %cst_24 {dimension_numbers = #tpu.dot_dimension_numbers<[1], [0], [0], [1], [0, 0, 1, 1], [], []>} : vector<8x8xf32>, vector<8x4xf32>, vector<8x4xf32> -> vector<8x4xf32>
    %83 = tpu.reciprocal %81 : vector<8x1xf32> -> vector<8x1xf32>
    %84 = vector.broadcast %83 : vector<8x1xf32> to vector<8x4xf32>
    %85 = arith.mulf %82, %84 : vector<8x4xf32>
    %86 = vector.extract_strided_slice %0 {offsets = [0, 20], sizes = [8, 4], strides = [1, 1]} : vector<8x96xf32> to vector<8x4xf32>
    %87 = vector.extract_strided_slice %0 {offsets = [0, 52], sizes = [8, 4], strides = [1, 1]} : vector<8x96xf32> to vector<8x4xf32>
    %88 = vector.extract_strided_slice %0 {offsets = [0, 84], sizes = [8, 4], strides = [1, 1]} : vector<8x96xf32> to vector<8x4xf32>
    %cst_25 = arith.constant dense<0.000000e+00> : vector<8x8xf32>
    %89 = tpu.matmul %86, %87, %cst_25 {dimension_numbers = #tpu.dot_dimension_numbers<[1], [1], [0], [0], [0, 0, 1, 0], [], []>} : vector<8x4xf32>, vector<8x4xf32>, vector<8x8xf32> -> vector<8x8xf32>
    %cst_26 = arith.constant 5.000000e-01 : f32
    %90 = vector.broadcast %cst_26 : f32 to vector<8x8xf32>
    %91 = arith.mulf %89, %90 : vector<8x8xf32>
    %cst_27 = arith.constant dense<0xFF800000> : vector<8xf32>
    %92 = vector.multi_reduction <maximumf>, %91, %cst_27 [1] : vector<8x8xf32> to vector<8xf32>
    %93 = vector.shape_cast %92 : vector<8xf32> to vector<8x1xf32>
    %94 = vector.broadcast %93 : vector<8x1xf32> to vector<8x8xf32>
    %95 = arith.subf %91, %94 : vector<8x8xf32>
    %96 = math.exp %95 : vector<8x8xf32>
    %cst_28 = arith.constant dense<0.000000e+00> : vector<8xf32>
    %97 = vector.multi_reduction <add>, %96, %cst_28 [1] : vector<8x8xf32> to vector<8xf32>
    %98 = vector.shape_cast %97 : vector<8xf32> to vector<8x1xf32>
    %cst_29 = arith.constant dense<0.000000e+00> : vector<8x4xf32>
    %99 = tpu.matmul %96, %88, %cst_29 {dimension_numbers = #tpu.dot_dimension_numbers<[1], [0], [0], [1], [0, 0, 1, 1], [], []>} : vector<8x8xf32>, vector<8x4xf32>, vector<8x4xf32> -> vector<8x4xf32>
    %100 = tpu.reciprocal %98 : vector<8x1xf32> -> vector<8x1xf32>
    %101 = vector.broadcast %100 : vector<8x1xf32> to vector<8x4xf32>
    %102 = arith.mulf %99, %101 : vector<8x4xf32>
    %103 = vector.extract_strided_slice %0 {offsets = [0, 24], sizes = [8, 4], strides = [1, 1]} : vector<8x96xf32> to vector<8x4xf32>
    %104 = vector.extract_strided_slice %0 {offsets = [0, 56], sizes = [8, 4], strides = [1, 1]} : vector<8x96xf32> to vector<8x4xf32>
    %105 = vector.extract_strided_slice %0 {offsets = [0, 88], sizes = [8, 4], strides = [1, 1]} : vector<8x96xf32> to vector<8x4xf32>
    %cst_30 = arith.constant dense<0.000000e+00> : vector<8x8xf32>
    %106 = tpu.matmul %103, %104, %cst_30 {dimension_numbers = #tpu.dot_dimension_numbers<[1], [1], [0], [0], [0, 0, 1, 0], [], []>} : vector<8x4xf32>, vector<8x4xf32>, vector<8x8xf32> -> vector<8x8xf32>
    %cst_31 = arith.constant 5.000000e-01 : f32
    %107 = vector.broadcast %cst_31 : f32 to vector<8x8xf32>
    %108 = arith.mulf %106, %107 : vector<8x8xf32>
    %cst_32 = arith.constant dense<0xFF800000> : vector<8xf32>
    %109 = vector.multi_reduction <maximumf>, %108, %cst_32 [1] : vector<8x8xf32> to vector<8xf32>
    %110 = vector.shape_cast %109 : vector<8xf32> to vector<8x1xf32>
    %111 = vector.broadcast %110 : vector<8x1xf32> to vector<8x8xf32>
    %112 = arith.subf %108, %111 : vector<8x8xf32>
    %113 = math.exp %112 : vector<8x8xf32>
    %cst_33 = arith.constant dense<0.000000e+00> : vector<8xf32>
    %114 = vector.multi_reduction <add>, %113, %cst_33 [1] : vector<8x8xf32> to vector<8xf32>
    %115 = vector.shape_cast %114 : vector<8xf32> to vector<8x1xf32>
    %cst_34 = arith.constant dense<0.000000e+00> : vector<8x4xf32>
    %116 = tpu.matmul %113, %105, %cst_34 {dimension_numbers = #tpu.dot_dimension_numbers<[1], [0], [0], [1], [0, 0, 1, 1], [], []>} : vector<8x8xf32>, vector<8x4xf32>, vector<8x4xf32> -> vector<8x4xf32>
    %117 = tpu.reciprocal %115 : vector<8x1xf32> -> vector<8x1xf32>
    %118 = vector.broadcast %117 : vector<8x1xf32> to vector<8x4xf32>
    %119 = arith.mulf %116, %118 : vector<8x4xf32>
    %120 = vector.extract_strided_slice %0 {offsets = [0, 28], sizes = [8, 4], strides = [1, 1]} : vector<8x96xf32> to vector<8x4xf32>
    %121 = vector.extract_strided_slice %0 {offsets = [0, 60], sizes = [8, 4], strides = [1, 1]} : vector<8x96xf32> to vector<8x4xf32>
    %122 = vector.extract_strided_slice %0 {offsets = [0, 92], sizes = [8, 4], strides = [1, 1]} : vector<8x96xf32> to vector<8x4xf32>
    %cst_35 = arith.constant dense<0.000000e+00> : vector<8x8xf32>
    %123 = tpu.matmul %120, %121, %cst_35 {dimension_numbers = #tpu.dot_dimension_numbers<[1], [1], [0], [0], [0, 0, 1, 0], [], []>} : vector<8x4xf32>, vector<8x4xf32>, vector<8x8xf32> -> vector<8x8xf32>
    %cst_36 = arith.constant 5.000000e-01 : f32
    %124 = vector.broadcast %cst_36 : f32 to vector<8x8xf32>
    %125 = arith.mulf %123, %124 : vector<8x8xf32>
    %cst_37 = arith.constant dense<0xFF800000> : vector<8xf32>
    %126 = vector.multi_reduction <maximumf>, %125, %cst_37 [1] : vector<8x8xf32> to vector<8xf32>
    %127 = vector.shape_cast %126 : vector<8xf32> to vector<8x1xf32>
    %128 = vector.broadcast %127 : vector<8x1xf32> to vector<8x8xf32>
    %129 = arith.subf %125, %128 : vector<8x8xf32>
    %130 = math.exp %129 : vector<8x8xf32>
    %cst_38 = arith.constant dense<0.000000e+00> : vector<8xf32>
    %131 = vector.multi_reduction <add>, %130, %cst_38 [1] : vector<8x8xf32> to vector<8xf32>
    %132 = vector.shape_cast %131 : vector<8xf32> to vector<8x1xf32>
    %cst_39 = arith.constant dense<0.000000e+00> : vector<8x4xf32>
    %133 = tpu.matmul %130, %122, %cst_39 {dimension_numbers = #tpu.dot_dimension_numbers<[1], [0], [0], [1], [0, 0, 1, 1], [], []>} : vector<8x8xf32>, vector<8x4xf32>, vector<8x4xf32> -> vector<8x4xf32>
    %134 = tpu.reciprocal %132 : vector<8x1xf32> -> vector<8x1xf32>
    %135 = vector.broadcast %134 : vector<8x1xf32> to vector<8x4xf32>
    %136 = arith.mulf %133, %135 : vector<8x4xf32>
    %137 = tpu.concatenate %17, %34, %51, %68, %85, %102, %119, %136 in 1 : vector<8x4xf32>, vector<8x4xf32>, vector<8x4xf32>, vector<8x4xf32>, vector<8x4xf32>, vector<8x4xf32>, vector<8x4xf32>, vector<8x4xf32> -> vector<8x32xf32>
    %c0_40 = arith.constant 0 : index
    %c0_41 = arith.constant 0 : index
    %138 = vector.load %arg2[%c0_40, %c0_41] : memref<8x32xf32, #tpu.memory_space<vmem>>, vector<8x32xf32>
    tpu.vector_store %arg2[%c0_40, %c0_41], %137 {strides = array<i32>} : memref<8x32xf32, #tpu.memory_space<vmem>>, vector<8x32xf32>,
    return
  }
  func.func @transform_0(%arg0: i32) -> (i32, i32) {
    %c0_i32 = arith.constant 0 : i32
    %c0_i32_0 = arith.constant 0 : i32
    return %arg0, %c0_i32 : i32, i32
  }
  func.func @transform_1(%arg0: i32) -> (i32, i32) {
    %c0_i32 = arith.constant 0 : i32
    %c0_i32_0 = arith.constant 0 : i32
    return %arg0, %c0_i32 : i32, i32
  }
}

module attributes {stable_mosaic.version = 11 : i64} {
  func.func @_ln_ffn_kernel(%arg0: i32, %arg1: memref<8x32xf32, #tpu.memory_space<vmem>>, %arg2: memref<8x32xf32, #tpu.memory_space<vmem>>, %arg3: memref<1x32xf32, #tpu.memory_space<vmem>>, %arg4: memref<1x32xf32, #tpu.memory_space<vmem>>, %arg5: memref<32x32xf32, #tpu.memory_space<vmem>>, %arg6: memref<1x32xf32, #tpu.memory_space<vmem>>, %arg7: memref<32x32xf32, #tpu.memory_space<vmem>>, %arg8: memref<1x32xf32, #tpu.memory_space<vmem>>, %arg9: memref<8x32xf32, #tpu.memory_space<vmem>>) attributes {dimension_semantics = [#tpu.dimension_semantics<parallel>], iteration_bounds = array<i64: 2>, scalar_prefetch = 0 : i64, scratch_operands = 0 : i64, tpu.core_type = #tpu.core_type<tc>, window_params = [{transform_indices = @transform_0, window_bounds = array<i64: 8, 32>}, {transform_indices = @transform_1, window_bounds = array<i64: 8, 32>}, {pipeline_mode = #tpu.pipeline_mode<synchronous>, transform_indices = @transform_2, window_bounds = array<i64: 1, 32>}, {pipeline_mode = #tpu.pipeline_mode<synchronous>, transform_indices = @transform_3, window_bounds = array<i64: 1, 32>}, {pipeline_mode = #tpu.pipeline_mode<synchronous>, transform_indices = @transform_4, window_bounds = array<i64: 32, 32>}, {pipeline_mode = #tpu.pipeline_mode<synchronous>, transform_indices = @transform_5, window_bounds = array<i64: 1, 32>}, {pipeline_mode = #tpu.pipeline_mode<synchronous>, transform_indices = @transform_6, window_bounds = array<i64: 32, 32>}, {pipeline_mode = #tpu.pipeline_mode<synchronous>, transform_indices = @transform_7, window_bounds = array<i64: 1, 32>}, {transform_indices = @transform_8, window_bounds = array<i64: 8, 32>}]} {
    %c0 = arith.constant 0 : index
    %c0_0 = arith.constant 0 : index
    %0 = vector.load %arg1[%c0, %c0_0] : memref<8x32xf32, #tpu.memory_space<vmem>>, vector<8x32xf32>
    %c0_1 = arith.constant 0 : index
    %c0_2 = arith.constant 0 : index
    %1 = vector.load %arg2[%c0_1, %c0_2] : memref<8x32xf32, #tpu.memory_space<vmem>>, vector<8x32xf32>
    %2 = arith.addf %0, %1 : vector<8x32xf32>
    %c0_3 = arith.constant 0 : index
    %c0_4 = arith.constant 0 : index
    %3 = vector.load %arg3[%c0_3, %c0_4] : memref<1x32xf32, #tpu.memory_space<vmem>>, vector<1x32xf32>
    %c0_5 = arith.constant 0 : index
    %c0_6 = arith.constant 0 : index
    %4 = vector.load %arg4[%c0_5, %c0_6] : memref<1x32xf32, #tpu.memory_space<vmem>>, vector<1x32xf32>
    %cst = arith.constant dense<0.000000e+00> : vector<8xf32>
    %5 = vector.multi_reduction <add>, %2, %cst [1] : vector<8x32xf32> to vector<8xf32>
    %6 = vector.shape_cast %5 : vector<8xf32> to vector<8x1xf32>
    %cst_7 = arith.constant 3.200000e+01 : f32
    %7 = vector.broadcast %cst_7 : f32 to vector<8x1xf32>
    %8 = arith.divf %6, %7 : vector<8x1xf32>
    %9 = vector.broadcast %8 : vector<8x1xf32> to vector<8x32xf32>
    %10 = arith.subf %2, %9 : vector<8x32xf32>
    %11 = arith.mulf %10, %10 : vector<8x32xf32>
    %cst_8 = arith.constant dense<0.000000e+00> : vector<8xf32>
    %12 = vector.multi_reduction <add>, %11, %cst_8 [1] : vector<8x32xf32> to vector<8xf32>
    %13 = vector.shape_cast %12 : vector<8xf32> to vector<8x1xf32>
    %cst_9 = arith.constant 3.200000e+01 : f32
    %14 = vector.broadcast %cst_9 : f32 to vector<8x1xf32>
    %15 = arith.divf %13, %14 : vector<8x1xf32>
    %cst_10 = arith.constant 9.99999974E-6 : f32
    %16 = vector.broadcast %cst_10 : f32 to vector<8x1xf32>
    %17 = arith.addf %15, %16 : vector<8x1xf32>
    %18 = math.rsqrt %17 : vector<8x1xf32>
    %19 = vector.broadcast %18 : vector<8x1xf32> to vector<8x32xf32>
    %20 = arith.mulf %10, %19 : vector<8x32xf32>
    %21 = vector.broadcast %3 : vector<1x32xf32> to vector<8x32xf32>
    %22 = arith.mulf %20, %21 : vector<8x32xf32>
    %23 = vector.broadcast %4 : vector<1x32xf32> to vector<8x32xf32>
    %24 = arith.addf %22, %23 : vector<8x32xf32>
    %c0_11 = arith.constant 0 : index
    %c0_12 = arith.constant 0 : index
    %25 = vector.load %arg5[%c0_11, %c0_12] : memref<32x32xf32, #tpu.memory_space<vmem>>, vector<32x32xf32>
    %cst_13 = arith.constant dense<0.000000e+00> : vector<8x32xf32>
    %26 = tpu.matmul %24, %25, %cst_13 {dimension_numbers = #tpu.dot_dimension_numbers<[1], [0], [0], [1], [0, 0, 1, 1], [], []>} : vector<8x32xf32>, vector<32x32xf32>, vector<8x32xf32> -> vector<8x32xf32>
    %c0_14 = arith.constant 0 : index
    %c0_15 = arith.constant 0 : index
    %27 = vector.load %arg6[%c0_14, %c0_15] : memref<1x32xf32, #tpu.memory_space<vmem>>, vector<1x32xf32>
    %28 = vector.broadcast %27 : vector<1x32xf32> to vector<8x32xf32>
    %29 = arith.addf %26, %28 : vector<8x32xf32>
    %cst_16 = arith.constant 5.000000e-01 : f32
    %30 = vector.broadcast %cst_16 : f32 to vector<8x32xf32>
    %31 = arith.mulf %30, %29 : vector<8x32xf32>
    %cst_17 = arith.constant 0.707106769 : f32
    %32 = vector.broadcast %cst_17 : f32 to vector<8x32xf32>
    %33 = arith.mulf %29, %32 : vector<8x32xf32>
    %34 = math.erf %33 : vector<8x32xf32>
    %cst_18 = arith.constant 1.000000e+00 : f32
    %35 = vector.broadcast %cst_18 : f32 to vector<8x32xf32>
    %36 = arith.addf %35, %34 : vector<8x32xf32>
    %37 = arith.mulf %31, %36 : vector<8x32xf32>
    %c0_19 = arith.constant 0 : index
    %c0_20 = arith.constant 0 : index
    %38 = vector.load %arg7[%c0_19, %c0_20] : memref<32x32xf32, #tpu.memory_space<vmem>>, vector<32x32xf32>
    %cst_21 = arith.constant dense<0.000000e+00> : vector<8x32xf32>
    %39 = tpu.matmul %37, %38, %cst_21 {dimension_numbers = #tpu.dot_dimension_numbers<[1], [0], [0], [1], [0, 0, 1, 1], [], []>} : vector<8x32xf32>, vector<32x32xf32>, vector<8x32xf32> -> vector<8x32xf32>
    %c0_22 = arith.constant 0 : index
    %c0_23 = arith.constant 0 : index
    %40 = vector.load %arg8[%c0_22, %c0_23] : memref<1x32xf32, #tpu.memory_space<vmem>>, vector<1x32xf32>
    %41 = vector.broadcast %40 : vector<1x32xf32> to vector<8x32xf32>
    %42 = arith.addf %39, %41 : vector<8x32xf32>
    %43 = arith.addf %42, %2 : vector<8x32xf32>
    %c0_24 = arith.constant 0 : index
    %c0_25 = arith.constant 0 : index
    %44 = vector.load %arg9[%c0_24, %c0_25] : memref<8x32xf32, #tpu.memory_space<vmem>>, vector<8x32xf32>
    tpu.vector_store %arg9[%c0_24, %c0_25], %43 {strides = array<i32>} : memref<8x32xf32, #tpu.memory_space<vmem>>, vector<8x32xf32>,
    return
  }
  func.func @transform_0(%arg0: i32) -> (i32, i32) {
    %c0_i32 = arith.constant 0 : i32
    %c0_i32_0 = arith.constant 0 : i32
    return %arg0, %c0_i32 : i32, i32
  }
  func.func @transform_1(%arg0: i32) -> (i32, i32) {
    %c0_i32 = arith.constant 0 : i32
    %c0_i32_0 = arith.constant 0 : i32
    return %arg0, %c0_i32 : i32, i32
  }
  func.func @transform_2(%arg0: i32) -> (i32, i32) {
    %c0_i32 = arith.constant 0 : i32
    %c0_i32_0 = arith.constant 0 : i32
    %c0_i32_1 = arith.constant 0 : i32
    return %c0_i32, %c0_i32_0 : i32, i32
  }
  func.func @transform_3(%arg0: i32) -> (i32, i32) {
    %c0_i32 = arith.constant 0 : i32
    %c0_i32_0 = arith.constant 0 : i32
    %c0_i32_1 = arith.constant 0 : i32
    return %c0_i32, %c0_i32_0 : i32, i32
  }
  func.func @transform_4(%arg0: i32) -> (i32, i32) {
    %c0_i32 = arith.constant 0 : i32
    %c0_i32_0 = arith.constant 0 : i32
    %c0_i32_1 = arith.constant 0 : i32
    return %c0_i32, %c0_i32_0 : i32, i32
  }
  func.func @transform_5(%arg0: i32) -> (i32, i32) {
    %c0_i32 = arith.constant 0 : i32
    %c0_i32_0 = arith.constant 0 : i32
    %c0_i32_1 = arith.constant 0 : i32
    return %c0_i32, %c0_i32_0 : i32, i32
  }
  func.func @transform_6(%arg0: i32) -> (i32, i32) {
    %c0_i32 = arith.constant 0 : i32
    %c0_i32_0 = arith.constant 0 : i32
    %c0_i32_1 = arith.constant 0 : i32
    return %c0_i32, %c0_i32_0 : i32, i32
  }
  func.func @transform_7(%arg0: i32) -> (i32, i32) {
    %c0_i32 = arith.constant 0 : i32
    %c0_i32_0 = arith.constant 0 : i32
    %c0_i32_1 = arith.constant 0 : i32
    return %c0_i32, %c0_i32_0 : i32, i32
  }
  func.func @transform_8(%arg0: i32) -> (i32, i32) {
    %c0_i32 = arith.constant 0 : i32
    %c0_i32_0 = arith.constant 0 : i32
    return %arg0, %c0_i32 : i32, i32
  }
}

</mosaic_0001>

<bundles_post_ra>
// kernel: transformer_block.3
= control target key start
LH: loop header
LB: loop body
LE: loop exit
PB: predicated region body
PF: predicated region fallthrough
CT: control target
= control target key end

     0   :  { %s413_s18 = smov 0   ;;  %s461_s0 = inlined_call_operand.vmem [shape: f32[16,32], index: 0, kind: input, shape index: {}]   ;;  %s462_s1 = inlined_call_operand.vmem [shape: f32[1,32], index: 1, kind: input, shape index: {}]   ;;  %s463_s2 = inlined_call_operand.vmem [shape: f32[1,32], index: 2, kind: input, shape index: {}]   ;;  %s464_s3 = inlined_call_operand.vmem [shape: f32[32,96], index: 3, kind: input, shape index: {}]   ;;  %s465_s4 = inlined_call_operand.vmem [shape: f32[1,96], index: 4, kind: input, shape index: {}]   ;;  %s466_s5 = inlined_call_operand.vmem [shape: f32[16,96], index: 5, kind: output, shape index: {}]  }
   0x1 LB: > { %s348_s19 = sadd.s32 4294967295, %s380_s18   ;;  %p352_p0 = scmp.ge.s32.totalorder %s380_s18, 1  ;;  %s380_s18 = sphi %s413_s18, %s15_s18  }
   0x2   : > { %p186_p1 = scmp.lt.s32.totalorder %s380_s18, 3 }
   0x4   : > { %p187_p2 = pnand %p352_p0, %p186_p1 }
   0x5   : > { %p212_p3 = scmp.lt.s32.totalorder (!%p187_p2), %s348_s19, 1 }
   0x6   : > { %190 = sbr.rel (%p187_p2) target bundleno = 414 (0x19e), region = 40 }
   0xb   : > { %s468_s19 = smov (!%p212_p3, %s348_s19), 1  ;;  %vm223_vm0 = vcmask 261120   ;;  %v382_v2 = vmov 32.0   ;;  %v264_v14 = vld [vmem:[%s464_s3 + $0x18] sm:$0xff]  ;;  %v263_v15 = vld [vmem:[%s464_s3 + $0x10] sm:$0xff]  ;;  %v262_v16 = vld [vmem:[%s464_s3 + $0x8] sm:$0xff] }
   0xc   : > { %s353_s20 = sshll.u32 %s468_s19, 3  ;;  %370 = vrcp.f32 %v382_v2  ;;  %284 = vmatpush.msra.mxu0 %v264_v14  ;;  %v261_v17 = vld [vmem:[%s464_s3] sm:$0xff]  ;;  %vm293_vm5 = vcmask 785408  }
   0xd   : > { %s215_s23 = scalar_lea.vmem %s461_s0, %s353_s20  ;;  %v367_v27 = vld [vmem:[%s462_s1] ss:$0 sm:$0xff]  ;;  %s219_s15 = scalar_lea.vmem %s466_s5, %s353_s20 }
   0xe   : > { %v220_v0 = vld [vmem:[%s215_s23] sm:$0xff]  ;;  %285 = vmatpush.msra.mxu0 %v263_v15 }
   0xf   : > { %v224_v1 = vsel %vm223_vm0, %v220_v0, 0.0  ;;  %v368_v30 = vld [vmem:[%s463_s2] ss:$0 sm:$0xff] }
  0x10   : > { %225 = vadd.xlane.f32.xlu0 %v224_v1  ;;  %286 = vmatpush.msra.mxu0 %v262_v16  ;;  %v369_v33 = vld [vmem:[%s465_s4] ss:$0 sm:$0xff] }
  0x12   : > { %v371_v3 = vpop.eup %370  ;;  %287 = vmatpush.msra.mxu0 %v261_v17 }
  0x13   : > { %v228_v4 = vmul.f32 32.0, %v371_v3  ;;  %vm232_vm1 = vweird.f32 %v371_v3 }
  0x15   : > { %v229_v5 = vsub.f32 1.0, %v228_v4 }
  0x17   : > { %v230_v6 = vmul.f32 %v371_v3, %v229_v5 }
  0x19   : > { %v231_v7 = vadd.f32 %v371_v3, %v230_v6 }
  0x1b   : > { %v233_v8 = vsel %vm232_vm1, %v371_v3, %v231_v7 }
  0x83   : > { %v226_v9 = vpop.xlane.xlu0 %225 }
  0x84   : > { %v234_v10 = vmul.f32 %v233_v8, %v226_v9 }
  0x86   : > { %v235_v11 = vsub.f32 %v220_v0, %v234_v10 }
  0x88   : > { %v236_v12 = vmul.f32 %v235_v11, %v235_v11 }
  0x8a   : > { %v237_v13 = vsel %vm223_vm0, %v236_v12, 0.0 }
  0x8b   : > { %238 = vadd.xlane.f32.xlu0 %v237_v13 }
  0xfe   : > { %v239_v18 = vpop.xlane.xlu0 %238 }
  0xff   : > { %v240_v19 = vmul.f32 %v239_v18, %v233_v8 }
 0x101   : > { %v241_v20 = vadd.f32 1e-05, %v240_v19 }
 0x103   : > { %372 = vrsqrt.f32 %v241_v20  ;;  %vm248_vm3 = vweird.f32 %v241_v20 }
 0x109   : > { %v373_v21 = vpop.eup %372 }
 0x10a   : > { %v243_v22 = vmul.f32 %v373_v21, %v241_v20  ;;  %vm249_vm2 = vweird.f32 %v373_v21 }
 0x10b   : > { %vm250_vm4 = vmor %vm248_vm3, %vm249_vm2 }
 0x10c   : > { %v244_v23 = vmul.f32 %v373_v21, %v243_v22 }
 0x10e   : > { %v245_v24 = vmul.f32 0.5, %v244_v23 }
 0x110   : > { %v246_v25 = vsub.f32 1.5, %v245_v24 }
 0x112   : > { %v247_v26 = vmul.f32 %v373_v21, %v246_v25 }
 0x114   : > { %v251_v28 = vsel %vm250_vm4, %v373_v21, %v247_v26 }
 0x115   : > { %v252_v29 = vmul.f32 %v251_v28, %v235_v11 }
 0x117   : > { %v256_v31 = vmul.f32 %v367_v27, %v252_v29 }
 0x119   : > { %v260_v32 = vadd.f32 %v368_v30, %v256_v31 }
 0x11b   : > { %355 = vmatmul.msk.f32.vlgmr.msra.gmra.mxu0 %vm223_vm0, %v260_v32 }
 0x198   : > { %v289_v34 = vpop.f32.mrf.mxu0 }
 0x199   : > { %v290_v35 = vadd.f32 %v369_v33, %v289_v34 }
 0x19b   : > { %v292_v36 = vmax.f32 %v290_v35, 0.0 }
 0x19d   : > { %294 = vst.msk [vmem:[%s219_s15] sm:$0xff] %vm293_vm5, %v292_v36 }
 0x19e PF: > { %s15_s18 = sadd.s32 1, %s380_s18  }
 0x19f   : > { %p12_p4 = scmp.ge.s32.totalorder %s15_s18, 4  }
 0x1a1   :  { %14 = sbr.rel (!%p12_p4) target bundleno = 1 (0x1), region = 70 }

// kernel: transformer_block.4
= control target key start
LH: loop header
LB: loop body
LE: loop exit
PB: predicated region body
PF: predicated region fallthrough
CT: control target
= control target key end

     0   :  { %s992_s6 = smov 0   ;;  %s1113_s0 = inlined_call_operand.vmem [shape: f32[16,96], index: 0, kind: input, shape index: {}]   ;;  %s1114_s1 = inlined_call_operand.vmem [shape: f32[16,32], index: 1, kind: output, shape index: {}]  }
   0x1 LB: > { %s841_s7 = sadd.s32 4294967295, %s950_s6   ;;  %p845_p0 = scmp.ge.s32.totalorder %s950_s6, 1  ;;  %s950_s6 = sphi %s992_s6, %s11_s6  }
   0x2   : > { %p86_p1 = scmp.lt.s32.totalorder %s950_s6, 3 }
   0x4   : > { %p87_p2 = pnand %p845_p0, %p86_p1 }
   0x5   : > { %p104_p3 = scmp.lt.s32.totalorder (!%p87_p2), %s841_s7, 1  ;;  %s952_s12 = smov (!%p87_p2), 92  }
   0x6   : > { %90 = sbr.rel (%p87_p2) target bundleno = 927 (0x39f), region = 24  ;;  %s953_s13 = smov (!%p87_p2), 96  }
   0x7   : > { %s954_s14 = smov (!%p87_p2), 124   ;;  %s955_s15 = smov (!%p87_p2), 84  }
   0x8   : > { %s956_s16 = smov (!%p87_p2), 116   ;;  %s957_s17 = smov (!%p87_p2), 64  }
   0x9   : > { %s958_s18 = smov (!%p87_p2), 76   ;;  %s959_s19 = smov (!%p87_p2), 108  }
   0xa   : > { %s960_s20 = smov (!%p87_p2), 68   ;;  %s961_s21 = smov (!%p87_p2), 88  }
   0xb   : > { %s1116_s7 = smov (!%p104_p3, %s841_s7), 1  ;;  %vm116_vm0 = vcmask 31744   ;;  %s962_s22 = smov 120   ;;  %vm142_vm1 = vcmask 64512  }
   0xc   : > { %s846_s8 = sshll.u32 %s1116_s7, 3  ;;  %s963_s23 = smov 80  }
   0xd   : > { %s107_s11 = scalar_lea.vmem %s1113_s0, %s846_s8  ;;  %s964_s24 = smov 112  }
   0xe   : > { %v1008_v0 = vld [vmem:[%s107_s11] sm:$0xff]  ;;  %s965_s25 = smov 72   ;;  %s966_s26 = smov 104  }
   0xf   : > { %195 = vrot.lane.b32.xlu1 %v1008_v0, %s952_s12  ;;  %114 = vrot.lane.b32.xlu0 %v1008_v0, %s953_s13  ;;  %s967_s27 = smov 60   ;;  %s968_s28 = smov 100  }
  0x10   : > { %152 = vrot.lane.b32.xlu2 %v1008_v0, %s957_s17  ;;  %s969_s29 = smov 52   ;;  %s970_s30 = smov 56  }
  0x11   : > { %s971_s2 = smov 48   ;;  %s972_s3 = smov 44  }
  0x12   : > { %s973_s4 = smov 40   ;;  %s974_s5 = smov 36  }
  0x13   : > { %s975_s9 = smov 12   ;;  %s976_s10 = smov 4  }
  0x14   : > { %s977_s11 = smov 8   ;;  %s978_s12 = smov 16  }
  0x15   : > { %s979_s13 = smov 20  }
  0x17   : > { %193 = vrot.lane.b32.xlu1 %v1008_v0, %s954_s14  ;;  %s980_s14 = smov 28  }
  0x18   : > { %274 = vrot.lane.b32.xlu2 %v1008_v0, %s961_s21 }
  0x1f   : > { %353 = vrot.lane.b32.xlu1 %v1008_v0, %s955_s15  ;;  %s981_s15 = smov 24  }
  0x20   : > { %272 = vrot.lane.b32.xlu2 %v1008_v0, %s962_s22 }
  0x27   : > { %351 = vrot.lane.b32.xlu1 %v1008_v0, %s956_s16 }
  0x28   : > { %432 = vrot.lane.b32.xlu2 %v1008_v0, %s963_s23 }
  0x2f   : > { %511 = vrot.lane.b32.xlu1 %v1008_v0, %s958_s18  ;;  %s111_s18 = scalar_lea.vmem %s1114_s1, %s846_s8 }
  0x30   : > { %430 = vrot.lane.b32.xlu2 %v1008_v0, %s964_s24 }
  0x37   : > { %509 = vrot.lane.b32.xlu1 %v1008_v0, %s959_s19 }
  0x38   : > { %590 = vrot.lane.b32.xlu2 %v1008_v0, %s965_s25 }
  0x3f   : > { %669 = vrot.lane.b32.xlu1 %v1008_v0, %s960_s20 }
  0x40   : > { %588 = vrot.lane.b32.xlu2 %v1008_v0, %s966_s26 }
  0x48   : > { %231 = vrot.lane.b32.xlu2 %v1008_v0, %s967_s27 }
  0x6a   : > { %v153_v14 = vpop.permute.xlu2 %152 }
  0x6b   : > { %173 = vmatpush.msra.mxu1 %v153_v14 }
  0x72   : > { %v275_v16 = vpop.permute.xlu2 %274 }
  0x73   : > { %854 = vmatpush.xpose.msk.msrb.mxu1 %vm116_vm0, %v275_v16 }
  0x7a   : > { %v273_v19 = vpop.permute.xlu2 %272 }
  0x81   : > { %v196_v1 = vpop.permute.xlu1 %195  ;;  %v115_v2 = vpop.permute.xlu0 %114 }
  0x82   : > { %848 = vmatpush.xpose.msk.msra.mxu0 %vm116_vm0, %v115_v2  ;;  %851 = vmatpush.xpose.msk.msra.mxu2 %vm116_vm0, %v196_v1  ;;  %v433_v22 = vpop.permute.xlu2 %432 }
  0x85   : > { %849 = vmatmul.msk.f32.vlgmr.msra.gmra.mxu0 %vm116_vm0, %v1008_v0 }
  0x89   : > { %v194_v3 = vpop.permute.xlu1 %193 }
  0x8a   : > { %852 = vmatmul.msk.f32.vlgmr.msra.gmra.mxu2 %vm116_vm0, %v194_v3  ;;  %v431_v24 = vpop.permute.xlu2 %430 }
  0x91   : > { %v354_v4 = vpop.permute.xlu1 %353 }
  0x92   : > { %857 = vmatpush.xpose.msk.msrb.mxu0 %vm116_vm0, %v354_v4  ;;  %v591_v26 = vpop.permute.xlu2 %590 }
  0x99   : > { %v352_v5 = vpop.permute.xlu1 %351 }
  0x9a   : > { %858 = vmatmul.msk.f32.vlgmr.msrb.gmra.mxu0 %vm116_vm0, %v352_v5  ;;  %v589_v27 = vpop.permute.xlu2 %588 }
  0xa1   : > { %v512_v6 = vpop.permute.xlu1 %511 }
  0xa2   : > { %863 = vmatpush.xpose.msk.msra.mxu0 %vm116_vm0, %v512_v6  ;;  %v232_v28 = vpop.permute.xlu2 %231 }
  0xa3   : > { %252 = vmatpush.msra.mxu3 %v232_v28 }
  0xa9   : > { %v510_v7 = vpop.permute.xlu1 %509 }
  0xaa   : > { %864 = vmatmul.msk.f32.vlgmr.msra.gmra.mxu0 %vm116_vm0, %v510_v7 }
  0xb1   : > { %v670_v25 = vpop.permute.xlu1 %669 }
  0xb2   : > { %869 = vmatpush.xpose.msk.msrb.mxu0 %vm116_vm0, %v670_v25 }
 0x102   : > { %v138_v8 = vpop.f32.mrf.mxu0 }
 0x103   : > { %v141_v9 = vmul.f32 0.5, %v138_v8 }
 0x105   : > { %v143_v10 = vsel %vm142_vm1, %v141_v9, -inf }
 0x106   : > { %144 = vmax.xlane.f32.xlu0 %v143_v10 }
 0x10d   : > { %v218_v11 = vpop.f32.mrf.mxu2 }
 0x10e   : > { %v221_v12 = vmul.f32 0.5, %v218_v11 }
 0x110   : > { %v222_v13 = vsel %vm142_vm1, %v221_v12, -inf }
 0x111   : > { %223 = vmax.xlane.f32.xlu1 %v222_v13 }
 0x117   : > { %v376_v15 = vpop.f32.mrf.mxu0 }
 0x118   : > { %v379_v17 = vmul.f32 0.5, %v376_v15 }
 0x11a   : > { %667 = vrot.lane.b32.xlu0 %v1008_v0, %s968_s28  ;;  %v380_v18 = vsel %vm142_vm1, %v379_v17, -inf }
 0x127   : > { %v534_v20 = vpop.f32.mrf.mxu0 }
 0x128   : > { %v537_v21 = vmul.f32 0.5, %v534_v20 }
 0x12a   : > { %389 = vrot.lane.b32.xlu1 %v1008_v0, %s969_s29  ;;  %v538_v23 = vsel %vm142_vm1, %v537_v21, -inf }
 0x144   : > { %381 = vmax.xlane.f32.xlu0 %v380_v18 }
 0x154   : > { %539 = vmax.xlane.f32.xlu1 %v538_v23 }
 0x158   : > { %310 = vrot.lane.b32.xlu0 %v1008_v0, %s970_s30 }
 0x16d   : > { %468 = vrot.lane.b32.xlu1 %v1008_v0, %s971_s2 }
 0x175   : > { %547 = vrot.lane.b32.xlu1 %v1008_v0, %s972_s3 }
 0x179   : > { %v145_v29 = vpop.xlane.xlu0 %144 }
 0x17a   : > { %v146_v30 = vsub.f32 %v141_v9, %v145_v29 }
 0x17c   : > { %v147_v31 = vmul.f32 1.442695, %v146_v30 }
 0x17e   : > { %912 = vpow2.f32 %v147_v31 }
 0x184   : > { %v1046_v32 = vpop.eup %912  ;;  %v224_v33 = vpop.xlane.xlu1 %223 }
 0x185   : > { %850 = vmatmul.msk.f32.vlgmr.msra.gmra.mxu1 %vm142_vm1, %v1046_v32  ;;  %v225_v34 = vsub.f32 %v221_v12, %v224_v33  ;;  %v149_v33 = vsel %vm142_vm1, %v1046_v32, 0.0 }
 0x186   : > { %860 = vmatpush.xpose.msk.msra.mxu1 %vm116_vm0, %v433_v22 }
 0x187   : > { %v226_v35 = vmul.f32 1.442695, %v225_v34 }
 0x189   : > { %914 = vpow2.f32 %v226_v35 }
 0x18c   : > { %v668_v36 = vpop.permute.xlu0 %667 }
 0x18d   : > { %855 = vmatmul.msk.f32.vlgmr.msrb.gmra.mxu1 %vm116_vm0, %v273_v19  ;;  %870 = vmatmul.msk.f32.vlgmr.msrb.gmra.mxu0 %vm116_vm0, %v668_v36 }
 0x18e   : > { %866 = vmatpush.xpose.msk.msrb.mxu1 %vm116_vm0, %v591_v26 }
 0x18f   : > { %v915_v37 = vpop.eup %914 }
 0x190   : > { %853 = vmatmul.msk.f32.vlgmr.msra.gmra.mxu3 %vm142_vm1, %v915_v37  ;;  %v228_v1 = vsel %vm142_vm1, %v915_v37, 0.0 }
 0x195   : > { %861 = vmatmul.msk.f32.vlgmr.msra.gmra.mxu1 %vm116_vm0, %v431_v24 }
 0x19c   : > { %v390_v38 = vpop.permute.xlu1 %389 }
 0x19d   : > { %867 = vmatmul.msk.f32.vlgmr.msrb.gmra.mxu1 %vm116_vm0, %v589_v27  ;;  %410 = vmatpush.msrb.mxu2 %v390_v38 }
 0x1b7   : > { %v382_v39 = vpop.xlane.xlu0 %381 }
 0x1b8   : > { %v383_v40 = vsub.f32 %v379_v17, %v382_v39 }
 0x1ba   : > { %v384_v41 = vmul.f32 1.442695, %v383_v40 }
 0x1bc   : > { %916 = vpow2.f32 %v384_v41 }
 0x1c2   : > { %v917_v42 = vpop.eup %916 }
 0x1c3   : > { %859 = vmatmul.msk.f32.vlgmr.msrb.gmra.mxu2 %vm142_vm1, %v917_v42  ;;  %v386_v59 = vsel %vm142_vm1, %v917_v42, 0.0 }
 0x1c7   : > { %v540_v43 = vpop.xlane.xlu1 %539 }
 0x1c8   : > { %v541_v44 = vsub.f32 %v537_v21, %v540_v43 }
 0x1ca   : > { %v542_v45 = vmul.f32 1.442695, %v541_v44  ;;  %v311_v63 = vpop.permute.xlu0 %310 }
 0x1cb   : > { %331 = vmatpush.msrb.mxu3 %v311_v63 }
 0x1cc   : > { %918 = vpow2.f32 %v542_v45 }
 0x1d2   : > { %v919_v48 = vpop.eup %918 }
 0x1d3   : > { %v544_v21 = vsel %vm142_vm1, %v919_v48, 0.0 }
 0x1df   : > { %v469_v46 = vpop.permute.xlu1 %468 }
 0x1e0   : > { %489 = vmatpush.msra.mxu3 %v469_v46 }
 0x1e7   : > { %v548_v47 = vpop.permute.xlu1 %547 }
 0x1e8   : > { %568 = vmatpush.msra.mxu2 %v548_v47 }
 0x1e9   : > { %865 = vmatmul.msk.f32.vlgmr.msra.gmra.mxu2 %vm142_vm1, %v919_v48 }
 0x202   : > { %v1059_v49 = vpop.f32.mrf.mxu1 }
 0x20a   : > { %v297_v50 = vpop.f32.mrf.mxu1  ;;  %v692_v51 = vpop.f32.mrf.mxu0 }
 0x20b   : > { %v300_v52 = vmul.f32 0.5, %v297_v50  ;;  %v695_v53 = vmul.f32 0.5, %v692_v51 }
 0x20d   : > { %v301_v54 = vsel %vm142_vm1, %v300_v52, -inf  ;;  %v696_v55 = vsel %vm142_vm1, %v695_v53, -inf }
 0x20e   : > { %302 = vmax.xlane.f32.xlu2 %v301_v54  ;;  %697 = vmax.xlane.f32.xlu0 %v696_v55 }
 0x212   : > { %v455_v56 = vpop.f32.mrf.mxu1 }
 0x213   : > { %v458_v57 = vmul.f32 0.5, %v455_v56  ;;  %v254_v48 = vpop.f32.mrf.mxu3 }
 0x215   : > { %v459_v58 = vsel %vm142_vm1, %v458_v57, -inf }
 0x216   : > { %460 = vmax.xlane.f32.xlu1 %v459_v58  ;;  %387 = vadd.xlane.f32.xlu0 %v386_v59 }
 0x21a   : > { %v613_v60 = vpop.f32.mrf.mxu1 }
 0x21b   : > { %v616_v61 = vmul.f32 0.5, %v613_v60 }
 0x21d   : > { %v617_v62 = vsel %vm142_vm1, %v616_v61, -inf }
 0x21e   : > { %618 = vmax.xlane.f32.xlu2 %v617_v62 }
 0x22f   : > { %626 = vrot.lane.b32.xlu1 %v1008_v0, %s973_s4 }
 0x236   : > { %705 = vrot.lane.b32.xlu2 %v1008_v0, %s974_s5 }
 0x246   : > { %v412_v37 = vpop.f32.mrf.mxu2 }
 0x259   : > { %229 = vadd.xlane.f32.xlu1 %v228_v1 }
 0x281   : > { %v303_v2 = vpop.xlane.xlu2 %302  ;;  %v698_v3 = vpop.xlane.xlu0 %697 }
 0x282   : > { %v304_v4 = vsub.f32 %v300_v52, %v303_v2  ;;  %v699_v5 = vsub.f32 %v695_v53, %v698_v3 }
 0x284   : > { %v305_v6 = vmul.f32 1.442695, %v304_v4  ;;  %v700_v7 = vmul.f32 1.442695, %v699_v5 }
 0x286   : > { %920 = vpow2.f32 %v305_v6 }
 0x287   : > { %922 = vpow2.f32 %v700_v7 }
 0x289   : > { %v461_v8 = vpop.xlane.xlu1 %460  ;;  %v388_v10 = vpop.xlane.xlu0 %387 }
 0x28a   : > { %v462_v9 = vsub.f32 %v458_v57, %v461_v8  ;;  %924 = vrcp.f32 %v388_v10  ;;  %v426_v30 = vand.u32 2147483648, %v388_v10  ;;  %vm420_vm3 = vweird.f32 %v388_v10 }
 0x28b   : > { %v424_v31 = vand.u32 2147483647, %v388_v10 }
 0x28c   : > { %v921_v11 = vpop.eup %920  ;;  %v463_v12 = vmul.f32 1.442695, %v462_v9  ;;  %v427_v35 = vor.u32 1.1754944e-38, %v426_v30 }
 0x28d   : > { %v923_v13 = vpop.eup %922  ;;  %856 = vmatmul.msk.f32.vlgmr.msrb.gmra.mxu3 %vm142_vm1, %v921_v11  ;;  %v307_v0 = vsel %vm142_vm1, %v921_v11, 0.0  ;;  %vm425_vm5 = vcmp.eq.f32.partialorder %v424_v31, 8.507059e+37 }
 0x28e   : > { %926 = vpow2.f32 %v463_v12  ;;  %308 = vadd.xlane.f32.xlu0 %v307_v0  ;;  %v702_v14 = vsel %vm142_vm1, %v923_v13, 0.0 }
 0x28f   : > { %703 = vadd.xlane.f32.xlu1 %v702_v14 }
 0x290   : > { %v925_v17 = vpop.eup %924 }
 0x291   : > { %v619_v15 = vpop.xlane.xlu2 %618  ;;  %v416_v22 = vmul.f32 %v925_v17, %v388_v10  ;;  %vm421_vm2 = vweird.f32 %v925_v17 }
 0x292   : > { %v620_v16 = vsub.f32 %v616_v61, %v619_v15  ;;  %vm422_vm4 = vmor %vm420_vm3, %vm421_vm2 }
 0x293   : > { %v417_v24 = vsub.f32 1.0, %v416_v22 }
 0x294   : > { %v927_v18 = vpop.eup %926  ;;  %v621_v19 = vmul.f32 1.442695, %v620_v16 }
 0x295   : > { %862 = vmatmul.msk.f32.vlgmr.msra.gmra.mxu3 %vm142_vm1, %v927_v18  ;;  %v465_v20 = vsel %vm142_vm1, %v927_v18, 0.0  ;;  %v418_v27 = vmul.f32 %v925_v17, %v417_v24 }
 0x296   : > { %928 = vpow2.f32 %v621_v19  ;;  %466 = vadd.xlane.f32.xlu2 %v465_v20  ;;  %545 = vadd.xlane.f32.xlu0 %v544_v21 }
 0x297   : > { %v419_v29 = vadd.f32 %v925_v17, %v418_v27  ;;  %v570_v27 = vpop.f32.mrf.mxu2 }
 0x299   : > { %v706_v23 = vpop.permute.xlu2 %705  ;;  %v423_v34 = vsel %vm422_vm4, %v925_v17, %v419_v29 }
 0x29a   : > { %726 = vmatpush.msrb.mxu2 %v706_v23  ;;  %v428_v36 = vsel %vm425_vm5, %v427_v35, %v423_v34 }
 0x29b   : > { %871 = vmatmul.msk.f32.vlgmr.msrb.gmra.mxu2 %vm142_vm1, %v923_v13  ;;  %v429_v38 = vmul.f32 %v428_v36, %v412_v37 }
 0x29c   : > { %v929_v25 = vpop.eup %928 }
 0x29d   : > { %v623_v26 = vsel %vm142_vm1, %v929_v25, 0.0 }
 0x29e   : > { %624 = vadd.xlane.f32.xlu0 %v623_v26 }
 0x2a1   : > { %v627_v28 = vpop.permute.xlu1 %626 }
 0x2a2   : > { %647 = vmatpush.msrb.mxu3 %v627_v28 }
 0x2a3   : > { %868 = vmatmul.msk.f32.vlgmr.msrb.gmra.mxu3 %vm142_vm1, %v929_v25 }
 0x2a6   : > { %150 = vadd.xlane.f32.xlu0 %v149_v33 }
 0x2ae   : > { %755 = vrot.lane.b32.xlu2 %v429_v38, %s975_s9 }
 0x2cc   : > { %v230_v39 = vpop.xlane.xlu1 %229 }
 0x2cd   : > { %930 = vrcp.f32 %v230_v39  ;;  %v268_v43 = vand.u32 2147483648, %v230_v39  ;;  %v266_v45 = vand.u32 2147483647, %v230_v39  ;;  %vm262_vm7 = vweird.f32 %v230_v39 }
 0x2cf   : > { %v269_v46 = vor.u32 1.1754944e-38, %v268_v43  ;;  %vm267_vm9 = vcmp.eq.f32.partialorder %v266_v45, 8.507059e+37 }
 0x2d3   : > { %v931_v40 = vpop.eup %930 }
 0x2d4   : > { %v258_v41 = vmul.f32 %v931_v40, %v230_v39  ;;  %vm263_vm6 = vweird.f32 %v931_v40 }
 0x2d5   : > { %vm264_vm8 = vmor %vm262_vm7, %vm263_vm6 }
 0x2d6   : > { %v259_v42 = vsub.f32 1.0, %v258_v41 }
 0x2d8   : > { %v260_v44 = vmul.f32 %v931_v40, %v259_v42 }
 0x2da   : > { %v261_v32 = vadd.f32 %v931_v40, %v260_v44 }
 0x2dc   : > { %v265_v47 = vsel %vm264_vm8, %v931_v40, %v261_v32 }
 0x2dd   : > { %v270_v50 = vsel %vm267_vm9, %v269_v46, %v265_v47 }
 0x2de   : > { %v271_v51 = vmul.f32 %v270_v50, %v254_v48 }
 0x2e0   : > { %747 = vrot.lane.b32.xlu1 %v271_v51, %s976_s10 }
 0x301   : > { %v309_v52 = vpop.xlane.xlu0 %308 }
 0x302   : > { %932 = vrcp.f32 %v309_v52  ;;  %v1080_v53 = vpop.xlane.xlu1 %703  ;;  %v347_v59 = vand.u32 2147483648, %v309_v52  ;;  %v345_v61 = vand.u32 2147483647, %v309_v52  ;;  %vm341_vm11 = vweird.f32 %v309_v52 }
 0x303   : > { %934 = vrcp.f32 %v1080_v53  ;;  %v742_v39 = vand.u32 2147483648, %v1080_v53  ;;  %vm736_vm9 = vweird.f32 %v1080_v53  ;;  %v740_v40 = vand.u32 2147483647, %v1080_v53 }
 0x304   : > { %v348_v3 = vor.u32 1.1754944e-38, %v347_v59  ;;  %vm346_vm13 = vcmp.eq.f32.partialorder %v345_v61, 8.507059e+37 }
 0x305   : > { %v743_v32 = vor.u32 1.1754944e-38, %v742_v39 }
 0x308   : > { %v933_v54 = vpop.eup %932 }
 0x309   : > { %v337_v55 = vmul.f32 %v933_v54, %v309_v52  ;;  %v467_v56 = vpop.xlane.xlu2 %466  ;;  %v546_v57 = vpop.xlane.xlu0 %545  ;;  %vm342_vm10 = vweird.f32 %v933_v54 }
 0x30a   : > { %936 = vrcp.f32 %v467_v56  ;;  %v1083_v62 = vpop.eup %934  ;;  %vm343_vm12 = vmor %vm341_vm11, %vm342_vm10  ;;  %v505_v0 = vand.u32 2147483648, %v467_v56  ;;  %v503_v16 = vand.u32 2147483647, %v467_v56  ;;  %v584_v18 = vand.u32 2147483648, %v546_v57 }
 0x30b   : > { %v338_v58 = vsub.f32 1.0, %v337_v55  ;;  %938 = vrcp.f32 %v546_v57  ;;  %v732_v5 = vmul.f32 %v1083_v62, %v1080_v53  ;;  %vm499_vm15 = vweird.f32 %v467_v56 }
 0x30c   : > { %v582_v20 = vand.u32 2147483647, %v546_v57  ;;  %vm578_vm3 = vweird.f32 %v546_v57  ;;  %v506_v22 = vor.u32 1.1754944e-38, %v505_v0  ;;  %vm504_vm5 = vcmp.eq.f32.partialorder %v503_v16, 8.507059e+37 }
 0x30d   : > { %v339_v60 = vmul.f32 %v933_v54, %v338_v58  ;;  %v733_v14 = vsub.f32 1.0, %v732_v5  ;;  %v585_v28 = vor.u32 1.1754944e-38, %v584_v18  ;;  %vm737_vm8 = vweird.f32 %v1083_v62 }
 0x30e   : > { %vm583_vm7 = vcmp.eq.f32.partialorder %v582_v20, 8.507059e+37  ;;  %vm738_vm11 = vmor %vm736_vm9, %vm737_vm8  ;;  %vm780_vm8 = vcmask 162816   ;;  %vm782_vm9 = vcmask 195584  }
 0x30f   : > { %v340_v63 = vadd.f32 %v933_v54, %v339_v60  ;;  %v734_v26 = vmul.f32 %v1083_v62, %v733_v14 }
 0x310   : > { %v937_v1 = vpop.eup %936  ;;  %v333_v2 = vpop.f32.mrf.mxu3 }
 0x311   : > { %v939_v4 = vpop.eup %938  ;;  %v495_v6 = vmul.f32 %v937_v1, %v467_v56  ;;  %v344_v7 = vsel %vm343_vm12, %v933_v54, %v340_v63  ;;  %v1087_v8 = vpop.xlane.xlu0 %624  ;;  %vm500_vm14 = vweird.f32 %v937_v1  ;;  %v735_v37 = vadd.f32 %v1083_v62, %v734_v26 }
 0x312   : > { %v574_v9 = vmul.f32 %v939_v4, %v546_v57  ;;  %v349_v10 = vsel %vm346_vm13, %v348_v3, %v344_v7  ;;  %940 = vrcp.f32 %v1087_v8  ;;  %vm579_vm2 = vweird.f32 %v939_v4  ;;  %vm501_vm4 = vmor %vm499_vm15, %vm500_vm14 }
 0x313   : > { %v496_v11 = vsub.f32 1.0, %v495_v6  ;;  %v350_v12 = vmul.f32 %v349_v10, %v333_v2  ;;  %vm580_vm6 = vmor %vm578_vm3, %vm579_vm2  ;;  %v663_v42 = vand.u32 2147483648, %v1087_v8  ;;  %v739_v43 = vsel %vm738_vm11, %v1083_v62, %v735_v37 }
 0x314   : > { %v575_v13 = vsub.f32 1.0, %v574_v9  ;;  %vm657_vm12 = vweird.f32 %v1087_v8  ;;  %v661_v44 = vand.u32 2147483647, %v1087_v8  ;;  %vm741_vm14 = vcmp.eq.f32.partialorder %v740_v40, 8.507059e+37  ;;  %v756_v9 = vpop.permute.xlu2 %755 }
 0x315   : > { %751 = vrot.lane.b32.xlu0 %v350_v12, %s977_s11  ;;  %v497_v15 = vmul.f32 %v937_v1, %v496_v11  ;;  %v744_v47 = vsel %vm741_vm14, %v743_v32, %v739_v43  ;;  %v664_v48 = vor.u32 1.1754944e-38, %v663_v42  ;;  %vm786_vm11 = vcmask 261120  }
 0x316   : > { %v576_v17 = vmul.f32 %v939_v4, %v575_v13  ;;  %vm662_vm15 = vcmp.eq.f32.partialorder %v661_v44, 8.507059e+37 }
 0x317   : > { %v498_v19 = vadd.f32 %v937_v1, %v497_v15 }
 0x318   : > { %v941_v21 = vpop.eup %940  ;;  %v577_v23 = vadd.f32 %v939_v4, %v576_v17  ;;  %v491_v29 = vpop.f32.mrf.mxu3 }
 0x319   : > { %v653_v24 = vmul.f32 %v941_v21, %v1087_v8  ;;  %v502_v25 = vsel %vm501_vm4, %v937_v1, %v498_v19  ;;  %vm658_vm10 = vweird.f32 %v941_v21  ;;  %v151_v54 = vpop.xlane.xlu0 %150 }
 0x31a   : > { %v507_v30 = vsel %vm504_vm5, %v506_v22, %v502_v25  ;;  %v581_v34 = vsel %vm580_vm6, %v939_v4, %v577_v23  ;;  %vm659_vm13 = vmor %vm657_vm12, %vm658_vm10  ;;  %942 = vrcp.f32 %v151_v54  ;;  %v189_v60 = vand.u32 2147483648, %v151_v54 }
 0x31b   : > { %v654_v31 = vsub.f32 1.0, %v653_v24  ;;  %v508_v33 = vmul.f32 %v507_v30, %v491_v29  ;;  %v586_v35 = vsel %vm583_vm7, %v585_v28, %v581_v34  ;;  %vm183_vm3 = vweird.f32 %v151_v54 }
 0x31c   : > { %v587_v36 = vmul.f32 %v586_v35, %v570_v27  ;;  %v187_v61 = vand.u32 2147483647, %v151_v54  ;;  %v190_v2 = vor.u32 1.1754944e-38, %v189_v60  ;;  %vm776_vm6 = vcmask 97280  }
 0x31d   : > { %759 = vrot.lane.b32.xlu0 %v508_v33, %s978_s12  ;;  %v655_v38 = vmul.f32 %v941_v21, %v654_v31  ;;  %vm778_vm7 = vcmask 130048   ;;  %vm784_vm10 = vcmask 228352  }
 0x31e   : > { %763 = vrot.lane.b32.xlu1 %v587_v36, %s979_s13  ;;  %v728_v45 = vpop.f32.mrf.mxu2  ;;  %vm188_vm5 = vcmp.eq.f32.partialorder %v187_v61, 8.507059e+37 }
 0x31f   : > { %v656_v41 = vadd.f32 %v941_v21, %v655_v38  ;;  %v745_v50 = vmul.f32 %v744_v47, %v728_v45 }
 0x320   : > { %v943_v55 = vpop.eup %942 }
 0x321   : > { %v660_v46 = vsel %vm659_vm13, %v941_v21, %v656_v41  ;;  %v179_v56 = vmul.f32 %v943_v55, %v151_v54  ;;  %vm184_vm2 = vweird.f32 %v943_v55 }
 0x322   : > { %v665_v52 = vsel %vm662_vm15, %v664_v48, %v660_v46  ;;  %vm185_vm4 = vmor %vm183_vm3, %vm184_vm2 }
 0x323   : > { %v180_v57 = vsub.f32 1.0, %v179_v56 }
 0x325   : > { %v181_v58 = vmul.f32 %v943_v55, %v180_v57 }
 0x326   : > { %v649_v51 = vpop.f32.mrf.mxu3  ;;  %771 = vrot.lane.b32.xlu1 %v745_v50, %s980_s14 }
 0x327   : > { %v666_v53 = vmul.f32 %v665_v52, %v649_v51  ;;  %v182_v59 = vadd.f32 %v943_v55, %v181_v58 }
 0x329   : > { %767 = vrot.lane.b32.xlu0 %v666_v53, %s981_s15  ;;  %v186_v1 = vsel %vm185_vm4, %v943_v55, %v182_v59 }
 0x32a   : > { %v191_v3 = vsel %vm188_vm5, %v190_v2, %v186_v1 }
 0x32b   : > { %v192_v4 = vmul.f32 %v191_v3, %v1059_v49 }
 0x352   : > { %v748_v63 = vpop.permute.xlu1 %747 }
 0x353   : > { %v774_v6 = vsel %vm116_vm0, %v192_v4, %v748_v63 }
 0x387   : > { %v752_v62 = vpop.permute.xlu0 %751 }
 0x388   : > { %v775_v8 = vsel %vm142_vm1, %v774_v6, %v752_v62 }
 0x389   : > { %v777_v10 = vsel %vm776_vm6, %v775_v8, %v756_v9 }
 0x38f   : > { %v760_v7 = vpop.permute.xlu0 %759 }
 0x390   : > { %v764_v5 = vpop.permute.xlu1 %763  ;;  %v779_v11 = vsel %vm778_vm7, %v777_v10, %v760_v7 }
 0x391   : > { %v781_v49 = vsel %vm780_vm8, %v779_v11, %v764_v5 }
 0x398   : > { %v772_v13 = vpop.permute.xlu1 %771 }
 0x39b   : > { %v768_v12 = vpop.permute.xlu0 %767 }
 0x39c   : > { %v783_v0 = vsel %vm782_vm9, %v781_v49, %v768_v12 }
 0x39d   : > { %v785_v14 = vsel %vm784_vm10, %v783_v0, %v772_v13 }
 0x39e   : > { %787 = vst.msk [vmem:[%s111_s18] sm:$0xff] %vm786_vm11, %v785_v14 }
 0x39f PF: > { %s11_s6 = sadd.s32 1, %s950_s6  }
 0x3a0   : > { %p8_p4 = scmp.ge.s32.totalorder %s11_s6, 4  }
 0x3a2   :  { %10 = sbr.rel (!%p8_p4) target bundleno = 1 (0x1), region = 54 }

// kernel: transformer_block.5
= control target key start
LH: loop header
LB: loop body
LE: loop exit
PB: predicated region body
PF: predicated region fallthrough
CT: control target
= control target key end

     0   :  { %13 = vsyncpa [#allocation3], 0  ;;  %s864_s0 = inlined_call_operand.vmem [shape: f32[16,32], index: 0, kind: input, shape index: {}]   ;;  %s865_s1 = inlined_call_operand.vmem [shape: f32[16,32], index: 1, kind: input, shape index: {}]   ;;  %s866_s2 = inlined_call_operand.vmem [shape: f32[1,32], index: 2, kind: input, shape index: {}]   ;;  %s867_s3 = inlined_call_operand.vmem [shape: f32[1,32], index: 3, kind: input, shape index: {}]   ;;  %s868_s4 = inlined_call_operand.vmem [shape: f32[32,32], index: 4, kind: input, shape index: {}]   ;;  %s869_s5 = inlined_call_operand.vmem [shape: f32[1,32], index: 5, kind: input, shape index: {}]   ;;  %s870_s6 = inlined_call_operand.vmem [shape: f32[32,32], index: 6, kind: input, shape index: {}]   ;;  %s871_s7 = inlined_call_operand.vmem [shape: f32[1,32], index: 7, kind: input, shape index: {}]   ;;  %s872_s8 = inlined_call_operand.hbm [shape: f32[16,32], index: 8, kind: output, shape index: {}]  }
   0x1   :  { %15 = vsyncpa [#allocation3 + $0x1], 0  ;;  %s730_s27 = smov 0   ;;  %s732_s28 = smov 0  }
   0x2   :  { %s734_s29 = smov 0   ;;  %s736_s30 = smov 0  }
   0x3 LB: > { %s751_s9 = sadd.s32 4294967295, %s682_s30   ;;  %s556_s10 = sadd.s32 4294967294, %s682_s30   ;;  %s682_s30 = sphi %s736_s30, %s878_s30   ;;  %s678_s29 = sphi %s734_s29, %s877_s29   ;;  %s674_s28 = sphi %s732_s28, %s876_s28   ;;  %s670_s27 = sphi %s730_s27, %s875_s27  }
   0x4   : > { %s755_s11 = sadd.s32 1, %s682_s30   ;;  %s206_s12 = sadd.s32 1, %s678_s29 }
   0x5   : > { %s203_s13 = ssub.s32 %s682_s30, %s755_s11  ;;  %p216_p0 = scmp.ne.s32.totalorder %s678_s29, %s674_s28 }
   0x6   : > { %p204_p1 = scmp.eq.s32.totalorder %s203_s13, 0  ;;  %p217_p2 = scmp.eq.s32.totalorder %s751_s9, 1 }
   0x7   : > { %p222_p3 = scmp.ne.s32.totalorder %s674_s28, %s670_s27  ;;  %p223_p4 = scmp.eq.s32.totalorder %s556_s10, 1 }
   0x8   : > { %s766_s14 = scalar_select %p204_p1, %s678_s29, %s206_s12  }
   0x9   : > { %p768_p5 = por %p217_p2, %p216_p0  ;;  %p772_p6 = por %p223_p4, %p222_p3 }
   0xa   : > { %p559_p7 = scmp.ge.s32.totalorder %s682_s30, 1  ;;  %p273_p8 = scmp.lt.s32.totalorder %s682_s30, 3 }
   0xc   : > { %p274_p9 = pnand %p559_p7, %p273_p8 }
   0xd   : > { %p310_p10 = scmp.lt.s32.totalorder (!%p274_p9), %s751_s9, 1  ;;  %s567_s23 = sshll.u32 (!%p274_p9), %s751_s9, 3 }
   0xe   : > { %277 = sbr.rel (%p274_p9) target bundleno = 607 (0x25f), region = 52  ;;  %s480_s12 = scalar_lea.hbm (!%p274_p9), %s872_s8, %s567_s23 }
  0x13   : > { %s311_s17 = scalar_select %p310_p10, %s751_s9, 1  ;;  %vm323_vm0 = vcmask 261120   ;;  %v684_v4 = vmov 32.0   ;;  %v364_v16 = vld [vmem:[%s868_s4 + $0x18] sm:$0xff]  ;;  %v363_v17 = vld [vmem:[%s868_s4 + $0x10] sm:$0xff]  ;;  %v362_v18 = vld [vmem:[%s868_s4 + $0x8] sm:$0xff] }
  0x14   : > { %614 = vrcp.f32 %v684_v4  ;;  %384 = vmatpush.msra.mxu0 %v364_v16  ;;  %v361_v19 = vld [vmem:[%s868_s4] sm:$0xff]  ;;  %v439_v47 = vld [vmem:[%s870_s6 + $0x18] sm:$0xff]  ;;  %v438_v48 = vld [vmem:[%s870_s6 + $0x10] sm:$0xff] }
  0x15   : > { %s561_s18 = sshll.u32 %s311_s17, 3  ;;  %v610_v29 = vld [vmem:[%s866_s2] ss:$0 sm:$0xff]  ;;  %459 = vmatpush.msra.mxu1 %v439_v47  ;;  %v437_v51 = vld [vmem:[%s870_s6 + $0x8] sm:$0xff] }
  0x16   : > { %s313_s21 = scalar_lea.vmem %s864_s0, %s561_s18  ;;  %s317_s24 = scalar_lea.vmem %s865_s1, %s561_s18  ;;  %385 = vmatpush.msra.mxu0 %v363_v17  ;;  %v611_v32 = vld [vmem:[%s867_s3] ss:$0 sm:$0xff] }
  0x17   : > { %v318_v0 = vld [vmem:[%s313_s21] sm:$0xff]  ;;  %460 = vmatpush.msra.mxu1 %v438_v48  ;;  %s307_s21 = sand.u32 1, %s674_s28   ;;  %s484_s18 = sshll.u32 %s480_s12, 4  ;;  %s485_s18 = int_to_ptr.hbm [resolvable:$true] %s484_s18 }
  0x18   : > { %v319_v1 = vld [vmem:[%s317_s24] sm:$0xff]  ;;  %386 = vmatpush.msra.mxu0 %v362_v18  ;;  %s560_s22 = sshll.u32 %s307_s21, 3  ;;  %s470_s9 = scalar_lea.sflag [#allocation3], %s307_s21 }
  0x19   : > { %v786_v2 = vadd.f32 %v319_v1, %v318_v0  ;;  %v612_v35 = vld [vmem:[%s869_s5] ss:$0 sm:$0xff]  ;;  %461 = vmatpush.msra.mxu1 %v437_v51  ;;  %s309_s13 = scalar_lea.vmem [#allocation2], %s560_s22  ;;  %s634_s19 = sshra.s32 %s485_s18, 4  ;;  %s635_s19 = int_to_ptr.hbm [resolvable:$true] %s634_s19 }
  0x1a   : > { %v615_v5 = vpop.eup %614  ;;  %387 = vmatpush.msra.mxu0 %v361_v19  ;;  %v436_v53 = vld [vmem:[%s870_s6] sm:$0xff]  ;;  %s482_s17 = sshll.u32 %s309_s13, 4  ;;  %s636_s20 = scalar_lea.hbm %s635_s19, 8  ;;  %s483_s17 = int_to_ptr.vmem [resolvable:$true] %s482_s17 }
  0x1b   : > { %v324_v3 = vsel %vm323_vm0, %v786_v2, 0.0  ;;  %v328_v6 = vmul.f32 32.0, %v615_v5  ;;  %vm332_vm1 = vweird.f32 %v615_v5  ;;  %462 = vmatpush.msra.mxu1 %v436_v53  ;;  %v613_v18 = vld [vmem:[%s871_s7] ss:$0 sm:$0xff]  ;;  %p637_p11 = scmp.ne.s32.totalorder %s635_s19, %s636_s20  ;;  %s640_s22 = scalar_lea.hbm %s872_s8, 16 }
  0x1c   : > { %325 = vadd.xlane.f32.xlu0 %v324_v3  ;;  %p641_p0 = scmp.lt.s32.totalorder %s635_s19, %s872_s8  ;;  %p642_p1 = scmp.lt.s32.totalorder %s640_s22, %s636_s20 }
  0x1d   : > { %v329_v7 = vsub.f32 1.0, %v328_v6  ;;  %p638_p12 = pnand %p637_p11, %p768_p5 }
  0x1e   : > { %p643_p2 = por %p642_p1, %p641_p0 }
  0x1f   : > { %v330_v8 = vmul.f32 %v615_v5, %v329_v7  ;;  %p639_p13 = pneg %p638_p12 }
  0x21   : > { %v331_v9 = vadd.f32 %v615_v5, %v330_v8  ;;  %p644_p3 = pnand %p643_p2, %p639_p13 }
  0x23   : > { %v333_v10 = vsel %vm332_vm1, %v615_v5, %v331_v9 }
  0x8f   : > { %v326_v11 = vpop.xlane.xlu0 %325 }
  0x90   : > { %v334_v12 = vmul.f32 %v333_v10, %v326_v11 }
  0x92   : > { %v335_v13 = vsub.f32 %v786_v2, %v334_v12 }
  0x94   : > { %v336_v14 = vmul.f32 %v335_v13, %v335_v13 }
  0x96   : > { %v337_v15 = vsel %vm323_vm0, %v336_v14, 0.0 }
  0x97   : > { %338 = vadd.xlane.f32.xlu0 %v337_v15 }
 0x10a   : > { %v339_v20 = vpop.xlane.xlu0 %338 }
 0x10b   : > { %v340_v21 = vmul.f32 %v339_v20, %v333_v10 }
 0x10d   : > { %v341_v22 = vadd.f32 1e-05, %v340_v21 }
 0x10f   : > { %616 = vrsqrt.f32 %v341_v22  ;;  %vm348_vm3 = vweird.f32 %v341_v22 }
 0x115   : > { %v617_v23 = vpop.eup %616 }
 0x116   : > { %v343_v24 = vmul.f32 %v617_v23, %v341_v22  ;;  %vm349_vm2 = vweird.f32 %v617_v23 }
 0x117   : > { %vm350_vm4 = vmor %vm348_vm3, %vm349_vm2 }
 0x118   : > { %v344_v25 = vmul.f32 %v617_v23, %v343_v24 }
 0x11a   : > { %v345_v26 = vmul.f32 0.5, %v344_v25 }
 0x11c   : > { %v346_v27 = vsub.f32 1.5, %v345_v26 }
 0x11e   : > { %v347_v28 = vmul.f32 %v617_v23, %v346_v27 }
 0x120   : > { %v351_v30 = vsel %vm350_vm4, %v617_v23, %v347_v28 }
 0x121   : > { %v352_v31 = vmul.f32 %v351_v30, %v335_v13 }
 0x123   : > { %v356_v33 = vmul.f32 %v610_v29, %v352_v31 }
 0x125   : > { %v360_v34 = vadd.f32 %v611_v32, %v356_v33 }
 0x127   : > { %563 = vmatmul.msk.f32.vlgmr.msra.gmra.mxu0 %vm323_vm0, %v360_v34 }
 0x1a4   : > { %v389_v36 = vpop.f32.mrf.mxu0 }
 0x1a5   : > { %v390_v37 = vadd.f32 %v612_v35, %v389_v36 }
 0x1a7   : > { %v393_v38 = vmul.f32 0.70710677, %v390_v37  ;;  %v392_v15 = vmul.f32 0.5, %v390_v37 }
 0x1a9   : > { %v394_v39 = vmul.f32 %v393_v38, %v393_v38 }
 0x1ab   : > { %v395_v40 = vmin.f32 %v394_v39, 16.0 }
 0x1ad   : > { %v396_v41 = vmul.f32 2.1237322e-06, %v395_v40  ;;  %v407_v42 = vmul.f32 3.8918573e-05, %v395_v40 }
 0x1af   : > { %v397_v43 = vadd.f32 0.00028619796, %v396_v41  ;;  %v408_v44 = vadd.f32 0.001143296, %v407_v42 }
 0x1b1   : > { %v398_v45 = vmul.f32 %v397_v43, %v395_v40  ;;  %v409_v46 = vmul.f32 %v408_v44, %v395_v40 }
 0x1b3   : > { %v410_v49 = vadd.f32 0.014752088, %v409_v46  ;;  %v399_v50 = vadd.f32 0.0036580483, %v398_v45 }
 0x1b5   : > { %v411_v52 = vmul.f32 %v410_v49, %v395_v40  ;;  %v400_v55 = vmul.f32 %v399_v50, %v395_v40 }
 0x1b7   : > { %v412_v54 = vadd.f32 0.112945676, %v411_v52  ;;  %v401_v58 = vadd.f32 0.05243302, %v400_v55 }
 0x1b9   : > { %v413_v56 = vmul.f32 %v412_v54, %v395_v40  ;;  %v402_v61 = vmul.f32 %v401_v58, %v395_v40 }
 0x1bb   : > { %v414_v57 = vadd.f32 0.4994258, %v413_v56  ;;  %v403_v62 = vadd.f32 0.18741608, %v402_v61 }
 0x1bd   : > { %v415_v59 = vmul.f32 %v414_v57, %v395_v40  ;;  %v404_v0 = vmul.f32 %v403_v62, %v395_v40 }
 0x1bf   : > { %v416_v60 = vadd.f32 1.0, %v415_v59  ;;  %v405_v5 = vadd.f32 1.1283791, %v404_v0 }
 0x1c1   : > { %618 = vrcp.f32 %v416_v60  ;;  %v428_v4 = vand.u32 2147483648, %v416_v60  ;;  %v426_v7 = vand.u32 2147483647, %v416_v60  ;;  %vm422_vm6 = vweird.f32 %v416_v60 }
 0x1c2   : > { %v406_v10 = vmul.f32 %v405_v5, %v393_v38 }
 0x1c3   : > { %v429_v9 = vor.u32 1.1754944e-38, %v428_v4  ;;  %vm427_vm8 = vcmp.eq.f32.partialorder %v426_v7, 8.507059e+37 }
 0x1c7   : > { %v619_v63 = vpop.eup %618 }
 0x1c8   : > { %v418_v1 = vmul.f32 %v619_v63, %v416_v60  ;;  %vm423_vm5 = vweird.f32 %v619_v63 }
 0x1c9   : > { %vm424_vm7 = vmor %vm422_vm6, %vm423_vm5 }
 0x1ca   : > { %v419_v3 = vsub.f32 1.0, %v418_v1 }
 0x1cc   : > { %v420_v6 = vmul.f32 %v619_v63, %v419_v3 }
 0x1ce   : > { %v421_v8 = vadd.f32 %v619_v63, %v420_v6 }
 0x1d0   : > { %v425_v11 = vsel %vm424_vm7, %v619_v63, %v421_v8 }
 0x1d1   : > { %v430_v12 = vsel %vm427_vm8, %v429_v9, %v425_v11 }
 0x1d2   : > { %v431_v13 = vmul.f32 %v430_v12, %v406_v10 }
 0x1d4   : > { %v564_v14 = vclamps-f32 %v431_v13, 1.0 }
 0x1d6   : > { %v434_v16 = vadd.f32 1.0, %v564_v14 }
 0x1d8   : > { %v435_v17 = vmul.f32 %v434_v16, %v392_v15 }
 0x1da   : > { %565 = vmatmul.msk.f32.vlgmr.msra.gmra.mxu1 %vm323_vm0, %v435_v17 }
 0x257   : > { %v464_v19 = vpop.f32.mrf.mxu1 }
 0x258   : > { %v465_v20 = vadd.f32 %v613_v18, %v464_v19 }
 0x25a   : > { %v467_v21 = vadd.f32 %v465_v20, %v786_v2 }
 0x25c   : > { %468 = vst.msk [vmem:[%s309_s13] sm:$0xff] %vm323_vm0, %v467_v21 }
 0x25d   : > { %647 = shalt.err (!%p644_p3)
}
 0x25e   : > { %570 = dma.vmem_to_hbm [thread:$0]  (%p768_p5), %s483_s17, 128, %s485_s18, %s470_s9  }
 0x25f PF: > { %p576_p4 = scmp.ge.s32.totalorder %s682_s30, 2  ;;  %s496_s21 = sand.u32 1, %s670_s27  }
 0x260   : > { %s497_s10 = scalar_lea.sflag [#allocation3], %s496_s21 }
 0x261   : > { %p573_p7 = pnand %p576_p4, %p772_p6 }
 0x263   : > { %p574_p8 = pneg %p573_p7 }
 0x265   : > { %665 = dma.done.wait (%p574_p8), %s497_s10, 128  }
 0x266   : > { %667 = vsyncadd (%p574_p8), %s497_s10, 4294967168  ;;  %p18_p9 = scmp.ge.s32.totalorder %s755_s11, 4   ;;  %s875_s27 = smov %s674_s28 }
 0x267   : > { %s876_s28 = smov %s678_s29  ;;  %s877_s29 = smov %s766_s14 }
 0x268   : > { %s878_s30 = smov %s755_s11  ;;  %20 = sbr.rel (!%p18_p9) target bundleno = 3 (0x3), region = 90 }
 0x26d   :  { %503 = vsyncpa [#allocation3], 1 }
 0x26e   :  { %505 = vsyncpa [#allocation3 + $0x1], 1 }

</bundles_post_ra>
